<compile_context>
chip_gen: v7x
topology: tpu7x:2x2x1
jax: 0.10.0
libtpu: 0.0.40
codegen_flags: <defaults>
</compile_context>

<pallas_src>
import math
from functools import partial

import jax
import jax.numpy as jnp
from jax.experimental import pallas as pl
from jax.experimental.pallas import tpu as pltpu

EPS = 1e-4            # RMSNorm eps (module default)
ROPE_THETA = 10000.0  # rotary_embedding_torch default


# ----------------------------- Pallas kernel ------------------------------- #
def _transformer_block_kernel(
    x_ref, g_attn_ref, wqkv_ref, wo_ref, cos_ref, sin_ref,
    g_ff_ref, w1_ref, b1_ref, w2_ref, b2_ref,
    out_ref, *, n_heads, d_head,
):
    S = x_ref.shape[1]
    D = x_ref.shape[2]
    half = d_head // 2
    ff = w1_ref.shape[1] // 2
    x = x_ref[0]                                              # (S, D) f32

    # ---- attention RMSNorm (f32 stats, rsqrt on EUP); bf16 matmul operand ----
    inv_rms = jax.lax.rsqrt(jnp.mean(x * x, axis=-1, keepdims=True) + EPS)
    a = (x * (g_attn_ref[...] * inv_rms)).astype(jnp.bfloat16)

    # ---- fused qkv projection: one (S,D)x(D,3D) MXU matmul, tile-aligned slices ----
    qkv = jnp.dot(a, wqkv_ref[...], preferred_element_type=jnp.float32)    # (S, 3D) f32
    q = qkv[:, :D]
    k = qkv[:, D:2 * D]
    v = qkv[:, 2 * D:]

    # ---- RoPE (half-split layout; q/k columns were permuted per head in the wrapper) ----
    cos = cos_ref[...]                                        # (S, d_head) f32
    sin = sin_ref[...]

    def rope(t):                                              # t: (S, d_head)
        rot = jnp.concatenate([-t[:, half:], t[:, :half]], axis=-1)
        return t * cos + rot * sin

    # ---- attention: mask reproduced verbatim (attend strictly-future keys) ----
    row = jax.lax.broadcasted_iota(jnp.int32, (S, S), 0)
    col = jax.lax.broadcasted_iota(jnp.int32, (S, S), 1)
    allowed = col > row                                       # ~tril; last row -> NaN (as torch)
    scale = 1.0 / math.sqrt(d_head)
    contract_last = (((1,), (1,)), ((), ()))                  # qh @ kh.T without transpose

    heads = []
    for h in range(n_heads):                                  # static loop: H is small
        sl = slice(h * d_head, (h + 1) * d_head)
        qh = rope(q[:, sl]).astype(jnp.bfloat16)
        kh = rope(k[:, sl]).astype(jnp.bfloat16)
        s = jax.lax.dot_general(qh, kh, contract_last,
                                preferred_element_type=jnp.float32) * scale
        s = jnp.where(allowed, s, -jnp.inf)
        p = jnp.exp(s - jnp.max(s, axis=-1, keepdims=True))   # fully-masked row -> NaN
        p = p * pl.reciprocal(jnp.sum(p, axis=-1, keepdims=True), approx=True)
        heads.append(jnp.dot(p.astype(jnp.bfloat16), v[:, sl].astype(jnp.bfloat16),
                             preferred_element_type=jnp.float32))
    attn = jnp.concatenate(heads, axis=-1).astype(jnp.bfloat16)            # (S, D)
    attn = jnp.dot(attn, wo_ref[...], preferred_element_type=jnp.float32)
    x1 = x + attn                                             # first residual (f32)

    # ---- FF RMSNorm + GLU feed-forward (fused w1, lane-dense 2*ff output) ----
    inv_rms2 = jax.lax.rsqrt(jnp.mean(x1 * x1, axis=-1, keepdims=True) + EPS)
    f = (x1 * (g_ff_ref[...] * inv_rms2)).astype(jnp.bfloat16)
    ug = jnp.dot(f, w1_ref[...], preferred_element_type=jnp.float32) + b1_ref[...]
    u = ug[:, :ff]
    g = ug[:, ff:]
    sig = pl.reciprocal(1.0 + jnp.exp(-u), approx=True)       # sigmoid on the EUP
    gated = (u * sig * g).astype(jnp.bfloat16)                # silu(u) * g
    ffo = jnp.dot(gated, w2_ref[...], preferred_element_type=jnp.float32) + b2_ref[...]

    out_ref[0] = (x1 + ffo).astype(out_ref.dtype)             # second residual


# ------------------------------- wrapper ----------------------------------- #
def transformer_block(x, params, n_heads):
    B, S, D = x.shape
    d_head = D // n_heads
    ff2 = params["w1_t"].shape[1]
    ff = ff2 // 2

    kernel = partial(_transformer_block_kernel, n_heads=n_heads, d_head=d_head)

    def rep(shape):                                 # grid-invariant (replicated) block
        nd = len(shape)
        return pl.BlockSpec(shape, lambda b, _nd=nd: (0,) * _nd)

    in_specs = [
        pl.BlockSpec((1, S, D), lambda b: (b, 0, 0)),   # x
        rep((1, D)),                                    # g_attn
        rep((D, 3 * D)),                                # wqkv_t (bf16, fused + head-permuted)
        rep((D, D)),                                    # wo_t   (bf16)
        rep((S, d_head)), rep((S, d_head)),             # cos, sin (half-split, per-head table)
        rep((1, D)),                                    # g_ff
        rep((D, ff2)), rep((1, ff2)),                   # w1_t (bf16), b1
        rep((ff, D)), rep((1, D)),                      # w2_t (bf16), b2
    ]

    return pl.pallas_call(
        kernel,
        out_shape=jax.ShapeDtypeStruct((B, S, D), x.dtype),
        grid_spec=pl.GridSpec(
            grid=(B,),
            in_specs=in_specs,
            out_specs=pl.BlockSpec((1, S, D), lambda b: (b, 0, 0)),
        ),
        compiler_params=pltpu.CompilerParams(
            dimension_semantics=("parallel",),
            vmem_limit_bytes=32 * 1024 * 1024,
        ),
    )(
        x, params["g_attn"], params["wqkv_t"], params["wo_t"],
        params["cos"], params["sin"], params["g_ff"],
        params["w1_t"], params["b1"], params["w2_t"], params["b2"],
    )


# --------------------- deterministic parameter setup ----------------------- #
def init_params(key, dim, n_heads, ff_dim, seq_len):
    d_head = dim // n_heads
    ks = jax.random.split(key, 8)

    def lin(k, fan_in, shape):
        return jax.random.normal(k, shape, jnp.float32) / math.sqrt(fan_in)

    # PyTorch-layout parameters (out_features, in_features)
    torch_p = dict(
        w_qkv=lin(ks[0], dim, (3 * dim, dim)),
        w_out=lin(ks[1], dim, (dim, dim)),
        w1=lin(ks[2], dim, (2 * ff_dim, dim)),
        b1=lin(ks[3], dim, (2 * ff_dim,)),
        w2=lin(ks[4], ff_dim, (dim, ff_dim)),
        b2=lin(ks[5], ff_dim, (dim,)),
        g_attn=1.0 + 0.1 * jax.random.normal(ks[6], (dim,), jnp.float32),
        g_ff=1.0 + 0.1 * jax.random.normal(ks[7], (dim,), jnp.float32),
    )

    # split qkv rows exactly like view(B,S,H,3,dh): row r -> (head, {q,k,v}, comp)
    w_qkv_r = torch_p["w_qkv"].reshape(n_heads, 3, d_head, dim)
    # within-head interleaved -> half-split permutation of the q/k OUTPUT columns.
    # Per-head q.k dot products are invariant under a permutation applied to BOTH q and k,
    # and in the permuted layout interleaved RoPE == half-split RoPE (two contiguous
    # slices in-kernel instead of a DxD "rotate_half" matmul).  V is left untouched.
    perm = jnp.concatenate([jnp.arange(0, d_head, 2), jnp.arange(1, d_head, 2)])
    wq_t = w_qkv_r[:, 0][:, perm, :].reshape(dim, dim).T
    wk_t = w_qkv_r[:, 1][:, perm, :].reshape(dim, dim).T
    wv_t = w_qkv_r[:, 2].reshape(dim, dim).T
    wqkv_t = jnp.concatenate([wq_t, wk_t, wv_t], axis=1)      # (D, 3D)

    # half-split RoPE tables, (S, d_head), shared across heads
    inv_freq = 1.0 / (ROPE_THETA ** (jnp.arange(0, d_head, 2, dtype=jnp.float32) / d_head))
    ang = jnp.arange(seq_len, dtype=jnp.float32)[:, None] * inv_freq[None, :]   # (S, dh/2)
    ang2 = jnp.concatenate([ang, ang], axis=-1)                                 # (S, dh)

    bf = jnp.bfloat16
    kernel_p = dict(
        g_attn=torch_p["g_attn"].reshape(1, dim),
        g_ff=torch_p["g_ff"].reshape(1, dim),
        wqkv_t=wqkv_t.astype(bf),
        wo_t=torch_p["w_out"].T.astype(bf),
        cos=jnp.cos(ang2), sin=jnp.sin(ang2),
        w1_t=torch_p["w1"].T.astype(bf),
        b1=torch_p["b1"].reshape(1, -1),
        w2_t=torch_p["w2"].T.astype(bf),
        b2=torch_p["b2"].reshape(1, -1),
    )
    return kernel_p, torch_p


# --------------------------- pure-JAX reference ----------------------------- #
# Mirrors the PyTorch module structure (torch-layout weights, interleaved RoPE,
# ~tril SDPA mask) under the same numeric contract as the kernel: bf16 matmul
# operands with f32 accumulation; norm/softmax statistics in f32.
def reference(x, tp, n_heads):
    B, S, D = x.shape
    dh = D // n_heads
    ff = tp["w2"].shape[1]
    bf = jnp.bfloat16

    def mm(a, b):
        return jnp.dot(a.astype(bf), b.astype(bf), preferred_element_type=jnp.float32)

    def rmsnorm(t, w):
        return t * (w / jnp.sqrt(jnp.mean(t * t, axis=-1, keepdims=True) + EPS))

    a = rmsnorm(x, tp["g_attn"])
    qkv = mm(a, tp["w_qkv"].T)                                     # (B,S,3D)
    qkv = qkv.reshape(B, S, n_heads, 3, dh).transpose(0, 2, 1, 3, 4)
    q, k, v = qkv[..., 0, :], qkv[..., 1, :], qkv[..., 2, :]       # (B,H,S,dh)

    inv_freq = 1.0 / (ROPE_THETA ** (jnp.arange(0, dh, 2, dtype=jnp.float32) / dh))
    ang = jnp.arange(S, dtype=jnp.float32)[:, None] * inv_freq[None, :]
    cos = jnp.repeat(jnp.cos(ang), 2, axis=-1)                     # (S, dh) interleaved
    sin = jnp.repeat(jnp.sin(ang), 2, axis=-1)

    def rope(t):                                                   # interleaved rotate_half
        tr = t.reshape(B, n_heads, S, dh // 2, 2)
        rot = jnp.stack([-tr[..., 1], tr[..., 0]], axis=-1).reshape(t.shape)
        return t * cos + rot * sin

    q, k = rope(q), rope(k)
    s = jnp.einsum("bhqd,bhkd->bhqk", q.astype(bf), k.astype(bf),
                   preferred_element_type=jnp.float32) / math.sqrt(dh)
    allowed = jnp.arange(S)[None, :] > jnp.arange(S)[:, None]      # ~tril (SDPA bool mask)
    s = jnp.where(allowed, s, -jnp.inf)
    p = jnp.exp(s - jnp.max(s, axis=-1, keepdims=True))
    p = p / jnp.sum(p, axis=-1, keepdims=True)                     # last row -> NaN (as torch)
    o = jnp.einsum("bhqk,bhkd->bhqd", p.astype(bf), v.astype(bf),
                   preferred_element_type=jnp.float32)
    o = o.transpose(0, 2, 1, 3).reshape(B, S, D)
    x1 = x + mm(o, tp["w_out"].T)

    f = rmsnorm(x1, tp["g_ff"])
    ug = mm(f, tp["w1"].T) + tp["b1"]
    u, g = ug[..., :ff], ug[..., ff:]
    gated = u * (1.0 / (1.0 + jnp.exp(-u))) * g
    return x1 + mm(gated, tp["w2"].T) + tp["b2"]


if __name__ == "__main__":
    # dim=128, n_heads=4 (d_head=32), ff hidden=128, seq=8, batch=2 -> lane-dense tiles
    B, S, D, H, FF = 2, 8, 128, 4, 128
    key = jax.random.PRNGKey(0)
    kx, kp = jax.random.split(key)
    x = jax.random.normal(kx, (B, S, D), jnp.float32)
    kernel_params, torch_params = init_params(kp, D, H, FF, S)

    out = transformer_block(x, kernel_params, H)
    out = jax.block_until_ready(out)
    assert out.shape == (B, S, D)

    ref = reference(x, torch_params, H)
    # tolerance covers the EUP approximate reciprocals (softmax denom / sigmoid);
    # the fully-masked last query row is NaN in both (equal_nan=True).
    if not bool(jnp.allclose(out, ref, atol=3e-2, rtol=3e-2, equal_nan=True)):
        raise AssertionError("Pallas output does not match JAX reference")
    print("KERNEL_OK")
</pallas_src>

<mosaic_0001>
module attributes {stable_mosaic.version = 11 : i64} {
  func.func @_transformer_block_kernel(%arg0: i32, %arg1: memref<1x8x128xf32, #tpu.memory_space<vmem>>, %arg2: memref<1x128xf32, #tpu.memory_space<vmem>>, %arg3: memref<128x384xbf16, #tpu.memory_space<vmem>>, %arg4: memref<128x128xbf16, #tpu.memory_space<vmem>>, %arg5: memref<8x32xf32, #tpu.memory_space<vmem>>, %arg6: memref<8x32xf32, #tpu.memory_space<vmem>>, %arg7: memref<1x128xf32, #tpu.memory_space<vmem>>, %arg8: memref<128x256xbf16, #tpu.memory_space<vmem>>, %arg9: memref<1x256xf32, #tpu.memory_space<vmem>>, %arg10: memref<128x128xbf16, #tpu.memory_space<vmem>>, %arg11: memref<1x128xf32, #tpu.memory_space<vmem>>, %arg12: memref<1x8x128xf32, #tpu.memory_space<vmem>>) attributes {dimension_semantics = [#tpu.dimension_semantics<parallel>], iteration_bounds = array<i64: 2>, scalar_prefetch = 0 : i64, scratch_operands = 0 : i64, tpu.core_type = #tpu.core_type<tc>, window_params = [{transform_indices = @transform_0, window_bounds = array<i64: 1, 8, 128>}, {pipeline_mode = #tpu.pipeline_mode<synchronous>, transform_indices = @transform_1, window_bounds = array<i64: 1, 128>}, {pipeline_mode = #tpu.pipeline_mode<synchronous>, transform_indices = @transform_2, window_bounds = array<i64: 128, 384>}, {pipeline_mode = #tpu.pipeline_mode<synchronous>, transform_indices = @transform_3, window_bounds = array<i64: 128, 128>}, {pipeline_mode = #tpu.pipeline_mode<synchronous>, transform_indices = @transform_4, window_bounds = array<i64: 8, 32>}, {pipeline_mode = #tpu.pipeline_mode<synchronous>, transform_indices = @transform_5, window_bounds = array<i64: 8, 32>}, {pipeline_mode = #tpu.pipeline_mode<synchronous>, transform_indices = @transform_6, window_bounds = array<i64: 1, 128>}, {pipeline_mode = #tpu.pipeline_mode<synchronous>, transform_indices = @transform_7, window_bounds = array<i64: 128, 256>}, {pipeline_mode = #tpu.pipeline_mode<synchronous>, transform_indices = @transform_8, window_bounds = array<i64: 1, 256>}, {pipeline_mode = #tpu.pipeline_mode<synchronous>, transform_indices = @transform_9, window_bounds = array<i64: 128, 128>}, {pipeline_mode = #tpu.pipeline_mode<synchronous>, transform_indices = @transform_10, window_bounds = array<i64: 1, 128>}, {transform_indices = @transform_11, window_bounds = array<i64: 1, 8, 128>}]} {
    %c0 = arith.constant 0 : index
    %c0_0 = arith.constant 0 : index
    %c0_1 = arith.constant 0 : index
    %0 = vector.load %arg1[%c0, %c0_0, %c0_1] : memref<1x8x128xf32, #tpu.memory_space<vmem>>, vector<1x8x128xf32>
    %1 = vector.shape_cast %0 : vector<1x8x128xf32> to vector<8x128xf32>
    %2 = arith.mulf %1, %1 : vector<8x128xf32>
    %cst = arith.constant dense<0.000000e+00> : vector<8xf32>
    %3 = vector.multi_reduction <add>, %2, %cst [1] : vector<8x128xf32> to vector<8xf32>
    %4 = vector.shape_cast %3 : vector<8xf32> to vector<8x1xf32>
    %cst_2 = arith.constant 1.280000e+02 : f32
    %5 = vector.broadcast %cst_2 : f32 to vector<8x1xf32>
    %6 = arith.divf %4, %5 : vector<8x1xf32>
    %cst_3 = arith.constant 9.99999974E-5 : f32
    %7 = vector.broadcast %cst_3 : f32 to vector<8x1xf32>
    %8 = arith.addf %6, %7 : vector<8x1xf32>
    %9 = math.rsqrt %8 : vector<8x1xf32>
    %c0_4 = arith.constant 0 : index
    %c0_5 = arith.constant 0 : index
    %10 = vector.load %arg2[%c0_4, %c0_5] : memref<1x128xf32, #tpu.memory_space<vmem>>, vector<1x128xf32>
    %11 = vector.broadcast %10 : vector<1x128xf32> to vector<8x128xf32>
    %12 = vector.broadcast %9 : vector<8x1xf32> to vector<8x128xf32>
    %13 = arith.mulf %11, %12 : vector<8x128xf32>
    %14 = arith.mulf %1, %13 : vector<8x128xf32>
    %15 = arith.truncf %14 : vector<8x128xf32> to vector<8x128xbf16>
    %c0_6 = arith.constant 0 : index
    %c0_7 = arith.constant 0 : index
    %16 = vector.load %arg3[%c0_6, %c0_7] : memref<128x384xbf16, #tpu.memory_space<vmem>>, vector<128x384xbf16>
    %cst_8 = arith.constant dense<0.000000e+00> : vector<8x384xf32>
    %17 = tpu.matmul %15, %16, %cst_8 {dimension_numbers = #tpu.dot_dimension_numbers<[1], [0], [0], [1], [0, 0, 1, 1], [], []>} : vector<8x128xbf16>, vector<128x384xbf16>, vector<8x384xf32> -> vector<8x384xf32>
    %18 = vector.extract_strided_slice %17 {offsets = [0, 0], sizes = [8, 128], strides = [1, 1]} : vector<8x384xf32> to vector<8x128xf32>
    %19 = vector.extract_strided_slice %17 {offsets = [0, 128], sizes = [8, 128], strides = [1, 1]} : vector<8x384xf32> to vector<8x128xf32>
    %20 = vector.extract_strided_slice %17 {offsets = [0, 256], sizes = [8, 128], strides = [1, 1]} : vector<8x384xf32> to vector<8x128xf32>
    %c0_9 = arith.constant 0 : index
    %c0_10 = arith.constant 0 : index
    %21 = vector.load %arg5[%c0_9, %c0_10] : memref<8x32xf32, #tpu.memory_space<vmem>>, vector<8x32xf32>
    %c0_11 = arith.constant 0 : index
    %c0_12 = arith.constant 0 : index
    %22 = vector.load %arg6[%c0_11, %c0_12] : memref<8x32xf32, #tpu.memory_space<vmem>>, vector<8x32xf32>
    %23 = tpu.iota {dimensions = array<i32: 0>} : vector<8x8xi32>
    %24 = tpu.iota {dimensions = array<i32: 1>} : vector<8x8xi32>
    %25 = arith.cmpi sgt, %24, %23 : vector<8x8xi32>
    %26 = vector.extract_strided_slice %18 {offsets = [0, 0], sizes = [8, 32], strides = [1, 1]} : vector<8x128xf32> to vector<8x32xf32>
    %27 = vector.extract_strided_slice %26 {offsets = [0, 16], sizes = [8, 16], strides = [1, 1]} : vector<8x32xf32> to vector<8x16xf32>
    %cst_13 = arith.constant 0.000000e+00 : f32
    %28 = vector.broadcast %cst_13 : f32 to vector<8x16xf32>
    %29 = arith.subf %28, %27 : vector<8x16xf32>
    %30 = vector.extract_strided_slice %26 {offsets = [0, 0], sizes = [8, 16], strides = [1, 1]} : vector<8x32xf32> to vector<8x16xf32>
    %31 = tpu.concatenate %29, %30 in 1 : vector<8x16xf32>, vector<8x16xf32> -> vector<8x32xf32>
    %32 = arith.mulf %26, %21 : vector<8x32xf32>
    %33 = arith.mulf %31, %22 : vector<8x32xf32>
    %34 = arith.addf %32, %33 : vector<8x32xf32>
    %35 = arith.truncf %34 : vector<8x32xf32> to vector<8x32xbf16>
    %36 = vector.extract_strided_slice %19 {offsets = [0, 0], sizes = [8, 32], strides = [1, 1]} : vector<8x128xf32> to vector<8x32xf32>
    %37 = vector.extract_strided_slice %36 {offsets = [0, 16], sizes = [8, 16], strides = [1, 1]} : vector<8x32xf32> to vector<8x16xf32>
    %cst_14 = arith.constant 0.000000e+00 : f32
    %38 = vector.broadcast %cst_14 : f32 to vector<8x16xf32>
    %39 = arith.subf %38, %37 : vector<8x16xf32>
    %40 = vector.extract_strided_slice %36 {offsets = [0, 0], sizes = [8, 16], strides = [1, 1]} : vector<8x32xf32> to vector<8x16xf32>
    %41 = tpu.concatenate %39, %40 in 1 : vector<8x16xf32>, vector<8x16xf32> -> vector<8x32xf32>
    %42 = arith.mulf %36, %21 : vector<8x32xf32>
    %43 = arith.mulf %41, %22 : vector<8x32xf32>
    %44 = arith.addf %42, %43 : vector<8x32xf32>
    %45 = arith.truncf %44 : vector<8x32xf32> to vector<8x32xbf16>
    %cst_15 = arith.constant dense<0.000000e+00> : vector<8x8xf32>
    %46 = tpu.matmul %35, %45, %cst_15 {dimension_numbers = #tpu.dot_dimension_numbers<[1], [1], [0], [0], [0, 0, 1, 0], [], []>} : vector<8x32xbf16>, vector<8x32xbf16>, vector<8x8xf32> -> vector<8x8xf32>
    %cst_16 = arith.constant 0.176776692 : f32
    %47 = vector.broadcast %cst_16 : f32 to vector<8x8xf32>
    %48 = arith.mulf %46, %47 : vector<8x8xf32>
    %cst_17 = arith.constant 0xFF800000 : f32
    %49 = vector.broadcast %cst_17 : f32 to vector<8x8xf32>
    %50 = arith.select %25, %48, %49 : vector<8x8xi1>, vector<8x8xf32>
    %cst_18 = arith.constant dense<0xFF800000> : vector<8xf32>
    %51 = vector.multi_reduction <maximumf>, %50, %cst_18 [1] : vector<8x8xf32> to vector<8xf32>
    %52 = vector.shape_cast %51 : vector<8xf32> to vector<8x1xf32>
    %53 = vector.broadcast %52 : vector<8x1xf32> to vector<8x8xf32>
    %54 = arith.subf %50, %53 : vector<8x8xf32>
    %55 = math.exp %54 : vector<8x8xf32>
    %cst_19 = arith.constant dense<0.000000e+00> : vector<8xf32>
    %56 = vector.multi_reduction <add>, %55, %cst_19 [1] : vector<8x8xf32> to vector<8xf32>
    %57 = vector.shape_cast %56 : vector<8xf32> to vector<8x1xf32>
    %58 = tpu.reciprocal %57 {approx = true} : vector<8x1xf32> -> vector<8x1xf32>
    %59 = vector.broadcast %58 : vector<8x1xf32> to vector<8x8xf32>
    %60 = arith.mulf %55, %59 : vector<8x8xf32>
    %61 = arith.truncf %60 : vector<8x8xf32> to vector<8x8xbf16>
    %62 = vector.extract_strided_slice %20 {offsets = [0, 0], sizes = [8, 32], strides = [1, 1]} : vector<8x128xf32> to vector<8x32xf32>
    %63 = arith.truncf %62 : vector<8x32xf32> to vector<8x32xbf16>
    %cst_20 = arith.constant dense<0.000000e+00> : vector<8x32xf32>
    %64 = tpu.matmul %61, %63, %cst_20 {dimension_numbers = #tpu.dot_dimension_numbers<[1], [0], [0], [1], [0, 0, 1, 1], [], []>} : vector<8x8xbf16>, vector<8x32xbf16>, vector<8x32xf32> -> vector<8x32xf32>
    %65 = vector.extract_strided_slice %18 {offsets = [0, 32], sizes = [8, 32], strides = [1, 1]} : vector<8x128xf32> to vector<8x32xf32>
    %66 = vector.extract_strided_slice %65 {offsets = [0, 16], sizes = [8, 16], strides = [1, 1]} : vector<8x32xf32> to vector<8x16xf32>
    %cst_21 = arith.constant 0.000000e+00 : f32
    %67 = vector.broadcast %cst_21 : f32 to vector<8x16xf32>
    %68 = arith.subf %67, %66 : vector<8x16xf32>
    %69 = vector.extract_strided_slice %65 {offsets = [0, 0], sizes = [8, 16], strides = [1, 1]} : vector<8x32xf32> to vector<8x16xf32>
    %70 = tpu.concatenate %68, %69 in 1 : vector<8x16xf32>, vector<8x16xf32> -> vector<8x32xf32>
    %71 = arith.mulf %65, %21 : vector<8x32xf32>
    %72 = arith.mulf %70, %22 : vector<8x32xf32>
    %73 = arith.addf %71, %72 : vector<8x32xf32>
    %74 = arith.truncf %73 : vector<8x32xf32> to vector<8x32xbf16>
    %75 = vector.extract_strided_slice %19 {offsets = [0, 32], sizes = [8, 32], strides = [1, 1]} : vector<8x128xf32> to vector<8x32xf32>
    %76 = vector.extract_strided_slice %75 {offsets = [0, 16], sizes = [8, 16], strides = [1, 1]} : vector<8x32xf32> to vector<8x16xf32>
    %cst_22 = arith.constant 0.000000e+00 : f32
    %77 = vector.broadcast %cst_22 : f32 to vector<8x16xf32>
    %78 = arith.subf %77, %76 : vector<8x16xf32>
    %79 = vector.extract_strided_slice %75 {offsets = [0, 0], sizes = [8, 16], strides = [1, 1]} : vector<8x32xf32> to vector<8x16xf32>
    %80 = tpu.concatenate %78, %79 in 1 : vector<8x16xf32>, vector<8x16xf32> -> vector<8x32xf32>
    %81 = arith.mulf %75, %21 : vector<8x32xf32>
    %82 = arith.mulf %80, %22 : vector<8x32xf32>
    %83 = arith.addf %81, %82 : vector<8x32xf32>
    %84 = arith.truncf %83 : vector<8x32xf32> to vector<8x32xbf16>
    %cst_23 = arith.constant dense<0.000000e+00> : vector<8x8xf32>
    %85 = tpu.matmul %74, %84, %cst_23 {dimension_numbers = #tpu.dot_dimension_numbers<[1], [1], [0], [0], [0, 0, 1, 0], [], []>} : vector<8x32xbf16>, vector<8x32xbf16>, vector<8x8xf32> -> vector<8x8xf32>
    %cst_24 = arith.constant 0.176776692 : f32
    %86 = vector.broadcast %cst_24 : f32 to vector<8x8xf32>
    %87 = arith.mulf %85, %86 : vector<8x8xf32>
    %cst_25 = arith.constant 0xFF800000 : f32
    %88 = vector.broadcast %cst_25 : f32 to vector<8x8xf32>
    %89 = arith.select %25, %87, %88 : vector<8x8xi1>, vector<8x8xf32>
    %cst_26 = arith.constant dense<0xFF800000> : vector<8xf32>
    %90 = vector.multi_reduction <maximumf>, %89, %cst_26 [1] : vector<8x8xf32> to vector<8xf32>
    %91 = vector.shape_cast %90 : vector<8xf32> to vector<8x1xf32>
    %92 = vector.broadcast %91 : vector<8x1xf32> to vector<8x8xf32>
    %93 = arith.subf %89, %92 : vector<8x8xf32>
    %94 = math.exp %93 : vector<8x8xf32>
    %cst_27 = arith.constant dense<0.000000e+00> : vector<8xf32>
    %95 = vector.multi_reduction <add>, %94, %cst_27 [1] : vector<8x8xf32> to vector<8xf32>
    %96 = vector.shape_cast %95 : vector<8xf32> to vector<8x1xf32>
    %97 = tpu.reciprocal %96 {approx = true} : vector<8x1xf32> -> vector<8x1xf32>
    %98 = vector.broadcast %97 : vector<8x1xf32> to vector<8x8xf32>
    %99 = arith.mulf %94, %98 : vector<8x8xf32>
    %100 = arith.truncf %99 : vector<8x8xf32> to vector<8x8xbf16>
    %101 = vector.extract_strided_slice %20 {offsets = [0, 32], sizes = [8, 32], strides = [1, 1]} : vector<8x128xf32> to vector<8x32xf32>
    %102 = arith.truncf %101 : vector<8x32xf32> to vector<8x32xbf16>
    %cst_28 = arith.constant dense<0.000000e+00> : vector<8x32xf32>
    %103 = tpu.matmul %100, %102, %cst_28 {dimension_numbers = #tpu.dot_dimension_numbers<[1], [0], [0], [1], [0, 0, 1, 1], [], []>} : vector<8x8xbf16>, vector<8x32xbf16>, vector<8x32xf32> -> vector<8x32xf32>
    %104 = vector.extract_strided_slice %18 {offsets = [0, 64], sizes = [8, 32], strides = [1, 1]} : vector<8x128xf32> to vector<8x32xf32>
    %105 = vector.extract_strided_slice %104 {offsets = [0, 16], sizes = [8, 16], strides = [1, 1]} : vector<8x32xf32> to vector<8x16xf32>
    %cst_29 = arith.constant 0.000000e+00 : f32
    %106 = vector.broadcast %cst_29 : f32 to vector<8x16xf32>
    %107 = arith.subf %106, %105 : vector<8x16xf32>
    %108 = vector.extract_strided_slice %104 {offsets = [0, 0], sizes = [8, 16], strides = [1, 1]} : vector<8x32xf32> to vector<8x16xf32>
    %109 = tpu.concatenate %107, %108 in 1 : vector<8x16xf32>, vector<8x16xf32> -> vector<8x32xf32>
    %110 = arith.mulf %104, %21 : vector<8x32xf32>
    %111 = arith.mulf %109, %22 : vector<8x32xf32>
    %112 = arith.addf %110, %111 : vector<8x32xf32>
    %113 = arith.truncf %112 : vector<8x32xf32> to vector<8x32xbf16>
    %114 = vector.extract_strided_slice %19 {offsets = [0, 64], sizes = [8, 32], strides = [1, 1]} : vector<8x128xf32> to vector<8x32xf32>
    %115 = vector.extract_strided_slice %114 {offsets = [0, 16], sizes = [8, 16], strides = [1, 1]} : vector<8x32xf32> to vector<8x16xf32>
    %cst_30 = arith.constant 0.000000e+00 : f32
    %116 = vector.broadcast %cst_30 : f32 to vector<8x16xf32>
    %117 = arith.subf %116, %115 : vector<8x16xf32>
    %118 = vector.extract_strided_slice %114 {offsets = [0, 0], sizes = [8, 16], strides = [1, 1]} : vector<8x32xf32> to vector<8x16xf32>
    %119 = tpu.concatenate %117, %118 in 1 : vector<8x16xf32>, vector<8x16xf32> -> vector<8x32xf32>
    %120 = arith.mulf %114, %21 : vector<8x32xf32>
    %121 = arith.mulf %119, %22 : vector<8x32xf32>
    %122 = arith.addf %120, %121 : vector<8x32xf32>
    %123 = arith.truncf %122 : vector<8x32xf32> to vector<8x32xbf16>
    %cst_31 = arith.constant dense<0.000000e+00> : vector<8x8xf32>
    %124 = tpu.matmul %113, %123, %cst_31 {dimension_numbers = #tpu.dot_dimension_numbers<[1], [1], [0], [0], [0, 0, 1, 0], [], []>} : vector<8x32xbf16>, vector<8x32xbf16>, vector<8x8xf32> -> vector<8x8xf32>
    %cst_32 = arith.constant 0.176776692 : f32
    %125 = vector.broadcast %cst_32 : f32 to vector<8x8xf32>
    %126 = arith.mulf %124, %125 : vector<8x8xf32>
    %cst_33 = arith.constant 0xFF800000 : f32
    %127 = vector.broadcast %cst_33 : f32 to vector<8x8xf32>
    %128 = arith.select %25, %126, %127 : vector<8x8xi1>, vector<8x8xf32>
    %cst_34 = arith.constant dense<0xFF800000> : vector<8xf32>
    %129 = vector.multi_reduction <maximumf>, %128, %cst_34 [1] : vector<8x8xf32> to vector<8xf32>
    %130 = vector.shape_cast %129 : vector<8xf32> to vector<8x1xf32>
    %131 = vector.broadcast %130 : vector<8x1xf32> to vector<8x8xf32>
    %132 = arith.subf %128, %131 : vector<8x8xf32>
    %133 = math.exp %132 : vector<8x8xf32>
    %cst_35 = arith.constant dense<0.000000e+00> : vector<8xf32>
    %134 = vector.multi_reduction <add>, %133, %cst_35 [1] : vector<8x8xf32> to vector<8xf32>
    %135 = vector.shape_cast %134 : vector<8xf32> to vector<8x1xf32>
    %136 = tpu.reciprocal %135 {approx = true} : vector<8x1xf32> -> vector<8x1xf32>
    %137 = vector.broadcast %136 : vector<8x1xf32> to vector<8x8xf32>
    %138 = arith.mulf %133, %137 : vector<8x8xf32>
    %139 = arith.truncf %138 : vector<8x8xf32> to vector<8x8xbf16>
    %140 = vector.extract_strided_slice %20 {offsets = [0, 64], sizes = [8, 32], strides = [1, 1]} : vector<8x128xf32> to vector<8x32xf32>
    %141 = arith.truncf %140 : vector<8x32xf32> to vector<8x32xbf16>
    %cst_36 = arith.constant dense<0.000000e+00> : vector<8x32xf32>
    %142 = tpu.matmul %139, %141, %cst_36 {dimension_numbers = #tpu.dot_dimension_numbers<[1], [0], [0], [1], [0, 0, 1, 1], [], []>} : vector<8x8xbf16>, vector<8x32xbf16>, vector<8x32xf32> -> vector<8x32xf32>
    %143 = vector.extract_strided_slice %18 {offsets = [0, 96], sizes = [8, 32], strides = [1, 1]} : vector<8x128xf32> to vector<8x32xf32>
    %144 = vector.extract_strided_slice %143 {offsets = [0, 16], sizes = [8, 16], strides = [1, 1]} : vector<8x32xf32> to vector<8x16xf32>
    %cst_37 = arith.constant 0.000000e+00 : f32
    %145 = vector.broadcast %cst_37 : f32 to vector<8x16xf32>
    %146 = arith.subf %145, %144 : vector<8x16xf32>
    %147 = vector.extract_strided_slice %143 {offsets = [0, 0], sizes = [8, 16], strides = [1, 1]} : vector<8x32xf32> to vector<8x16xf32>
    %148 = tpu.concatenate %146, %147 in 1 : vector<8x16xf32>, vector<8x16xf32> -> vector<8x32xf32>
    %149 = arith.mulf %143, %21 : vector<8x32xf32>
    %150 = arith.mulf %148, %22 : vector<8x32xf32>
    %151 = arith.addf %149, %150 : vector<8x32xf32>
    %152 = arith.truncf %151 : vector<8x32xf32> to vector<8x32xbf16>
    %153 = vector.extract_strided_slice %19 {offsets = [0, 96], sizes = [8, 32], strides = [1, 1]} : vector<8x128xf32> to vector<8x32xf32>
    %154 = vector.extract_strided_slice %153 {offsets = [0, 16], sizes = [8, 16], strides = [1, 1]} : vector<8x32xf32> to vector<8x16xf32>
    %cst_38 = arith.constant 0.000000e+00 : f32
    %155 = vector.broadcast %cst_38 : f32 to vector<8x16xf32>
    %156 = arith.subf %155, %154 : vector<8x16xf32>
    %157 = vector.extract_strided_slice %153 {offsets = [0, 0], sizes = [8, 16], strides = [1, 1]} : vector<8x32xf32> to vector<8x16xf32>
    %158 = tpu.concatenate %156, %157 in 1 : vector<8x16xf32>, vector<8x16xf32> -> vector<8x32xf32>
    %159 = arith.mulf %153, %21 : vector<8x32xf32>
    %160 = arith.mulf %158, %22 : vector<8x32xf32>
    %161 = arith.addf %159, %160 : vector<8x32xf32>
    %162 = arith.truncf %161 : vector<8x32xf32> to vector<8x32xbf16>
    %cst_39 = arith.constant dense<0.000000e+00> : vector<8x8xf32>
    %163 = tpu.matmul %152, %162, %cst_39 {dimension_numbers = #tpu.dot_dimension_numbers<[1], [1], [0], [0], [0, 0, 1, 0], [], []>} : vector<8x32xbf16>, vector<8x32xbf16>, vector<8x8xf32> -> vector<8x8xf32>
    %cst_40 = arith.constant 0.176776692 : f32
    %164 = vector.broadcast %cst_40 : f32 to vector<8x8xf32>
    %165 = arith.mulf %163, %164 : vector<8x8xf32>
    %cst_41 = arith.constant 0xFF800000 : f32
    %166 = vector.broadcast %cst_41 : f32 to vector<8x8xf32>
    %167 = arith.select %25, %165, %166 : vector<8x8xi1>, vector<8x8xf32>
    %cst_42 = arith.constant dense<0xFF800000> : vector<8xf32>
    %168 = vector.multi_reduction <maximumf>, %167, %cst_42 [1] : vector<8x8xf32> to vector<8xf32>
    %169 = vector.shape_cast %168 : vector<8xf32> to vector<8x1xf32>
    %170 = vector.broadcast %169 : vector<8x1xf32> to vector<8x8xf32>
    %171 = arith.subf %167, %170 : vector<8x8xf32>
    %172 = math.exp %171 : vector<8x8xf32>
    %cst_43 = arith.constant dense<0.000000e+00> : vector<8xf32>
    %173 = vector.multi_reduction <add>, %172, %cst_43 [1] : vector<8x8xf32> to vector<8xf32>
    %174 = vector.shape_cast %173 : vector<8xf32> to vector<8x1xf32>
    %175 = tpu.reciprocal %174 {approx = true} : vector<8x1xf32> -> vector<8x1xf32>
    %176 = vector.broadcast %175 : vector<8x1xf32> to vector<8x8xf32>
    %177 = arith.mulf %172, %176 : vector<8x8xf32>
    %178 = arith.truncf %177 : vector<8x8xf32> to vector<8x8xbf16>
    %179 = vector.extract_strided_slice %20 {offsets = [0, 96], sizes = [8, 32], strides = [1, 1]} : vector<8x128xf32> to vector<8x32xf32>
    %180 = arith.truncf %179 : vector<8x32xf32> to vector<8x32xbf16>
    %cst_44 = arith.constant dense<0.000000e+00> : vector<8x32xf32>
    %181 = tpu.matmul %178, %180, %cst_44 {dimension_numbers = #tpu.dot_dimension_numbers<[1], [0], [0], [1], [0, 0, 1, 1], [], []>} : vector<8x8xbf16>, vector<8x32xbf16>, vector<8x32xf32> -> vector<8x32xf32>
    %182 = tpu.concatenate %64, %103, %142, %181 in 1 : vector<8x32xf32>, vector<8x32xf32>, vector<8x32xf32>, vector<8x32xf32> -> vector<8x128xf32>
    %183 = arith.truncf %182 : vector<8x128xf32> to vector<8x128xbf16>
    %c0_45 = arith.constant 0 : index
    %c0_46 = arith.constant 0 : index
    %184 = vector.load %arg4[%c0_45, %c0_46] : memref<128x128xbf16, #tpu.memory_space<vmem>>, vector<128x128xbf16>
    %cst_47 = arith.constant dense<0.000000e+00> : vector<8x128xf32>
    %185 = tpu.matmul %183, %184, %cst_47 {dimension_numbers = #tpu.dot_dimension_numbers<[1], [0], [0], [1], [0, 0, 1, 1], [], []>} : vector<8x128xbf16>, vector<128x128xbf16>, vector<8x128xf32> -> vector<8x128xf32>
    %186 = arith.addf %1, %185 : vector<8x128xf32>
    %187 = arith.mulf %186, %186 : vector<8x128xf32>
    %cst_48 = arith.constant dense<0.000000e+00> : vector<8xf32>
    %188 = vector.multi_reduction <add>, %187, %cst_48 [1] : vector<8x128xf32> to vector<8xf32>
    %189 = vector.shape_cast %188 : vector<8xf32> to vector<8x1xf32>
    %cst_49 = arith.constant 1.280000e+02 : f32
    %190 = vector.broadcast %cst_49 : f32 to vector<8x1xf32>
    %191 = arith.divf %189, %190 : vector<8x1xf32>
    %cst_50 = arith.constant 9.99999974E-5 : f32
    %192 = vector.broadcast %cst_50 : f32 to vector<8x1xf32>
    %193 = arith.addf %191, %192 : vector<8x1xf32>
    %194 = math.rsqrt %193 : vector<8x1xf32>
    %c0_51 = arith.constant 0 : index
    %c0_52 = arith.constant 0 : index
    %195 = vector.load %arg7[%c0_51, %c0_52] : memref<1x128xf32, #tpu.memory_space<vmem>>, vector<1x128xf32>
    %196 = vector.broadcast %195 : vector<1x128xf32> to vector<8x128xf32>
    %197 = vector.broadcast %194 : vector<8x1xf32> to vector<8x128xf32>
    %198 = arith.mulf %196, %197 : vector<8x128xf32>
    %199 = arith.mulf %186, %198 : vector<8x128xf32>
    %200 = arith.truncf %199 : vector<8x128xf32> to vector<8x128xbf16>
    %c0_53 = arith.constant 0 : index
    %c0_54 = arith.constant 0 : index
    %201 = vector.load %arg8[%c0_53, %c0_54] : memref<128x256xbf16, #tpu.memory_space<vmem>>, vector<128x256xbf16>
    %cst_55 = arith.constant dense<0.000000e+00> : vector<8x256xf32>
    %202 = tpu.matmul %200, %201, %cst_55 {dimension_numbers = #tpu.dot_dimension_numbers<[1], [0], [0], [1], [0, 0, 1, 1], [], []>} : vector<8x128xbf16>, vector<128x256xbf16>, vector<8x256xf32> -> vector<8x256xf32>
    %c0_56 = arith.constant 0 : index
    %c0_57 = arith.constant 0 : index
    %203 = vector.load %arg9[%c0_56, %c0_57] : memref<1x256xf32, #tpu.memory_space<vmem>>, vector<1x256xf32>
    %204 = vector.broadcast %203 : vector<1x256xf32> to vector<8x256xf32>
    %205 = arith.addf %202, %204 : vector<8x256xf32>
    %206 = vector.extract_strided_slice %205 {offsets = [0, 0], sizes = [8, 128], strides = [1, 1]} : vector<8x256xf32> to vector<8x128xf32>
    %207 = vector.extract_strided_slice %205 {offsets = [0, 128], sizes = [8, 128], strides = [1, 1]} : vector<8x256xf32> to vector<8x128xf32>
    %cst_58 = arith.constant 0.000000e+00 : f32
    %208 = vector.broadcast %cst_58 : f32 to vector<8x128xf32>
    %209 = arith.subf %208, %206 : vector<8x128xf32>
    %210 = math.exp %209 : vector<8x128xf32>
    %cst_59 = arith.constant 1.000000e+00 : f32
    %211 = vector.broadcast %cst_59 : f32 to vector<8x128xf32>
    %212 = arith.addf %211, %210 : vector<8x128xf32>
    %213 = tpu.reciprocal %212 {approx = true} : vector<8x128xf32> -> vector<8x128xf32>
    %214 = arith.mulf %206, %213 : vector<8x128xf32>
    %215 = arith.mulf %214, %207 : vector<8x128xf32>
    %216 = arith.truncf %215 : vector<8x128xf32> to vector<8x128xbf16>
    %c0_60 = arith.constant 0 : index
    %c0_61 = arith.constant 0 : index
    %217 = vector.load %arg10[%c0_60, %c0_61] : memref<128x128xbf16, #tpu.memory_space<vmem>>, vector<128x128xbf16>
    %cst_62 = arith.constant dense<0.000000e+00> : vector<8x128xf32>
    %218 = tpu.matmul %216, %217, %cst_62 {dimension_numbers = #tpu.dot_dimension_numbers<[1], [0], [0], [1], [0, 0, 1, 1], [], []>} : vector<8x128xbf16>, vector<128x128xbf16>, vector<8x128xf32> -> vector<8x128xf32>
    %c0_63 = arith.constant 0 : index
    %c0_64 = arith.constant 0 : index
    %219 = vector.load %arg11[%c0_63, %c0_64] : memref<1x128xf32, #tpu.memory_space<vmem>>, vector<1x128xf32>
    %220 = vector.broadcast %219 : vector<1x128xf32> to vector<8x128xf32>
    %221 = arith.addf %218, %220 : vector<8x128xf32>
    %222 = arith.addf %186, %221 : vector<8x128xf32>
    %c0_65 = arith.constant 0 : index
    %c0_66 = arith.constant 0 : index
    %c0_67 = arith.constant 0 : index
    %223 = vector.load %arg12[%c0_65, %c0_66, %c0_67] : memref<1x8x128xf32, #tpu.memory_space<vmem>>, vector<1x8x128xf32>
    %224 = vector.shape_cast %223 : vector<1x8x128xf32> to vector<8x128xf32>
    %225 = vector.shape_cast %222 : vector<8x128xf32> to vector<1x8x128xf32>
    tpu.vector_store %arg12[%c0_65, %c0_66, %c0_67], %225 {strides = array<i32>} : memref<1x8x128xf32, #tpu.memory_space<vmem>>, vector<1x8x128xf32>,
    return
  }
  func.func @transform_0(%arg0: i32) -> (i32, i32, i32) {
    %c0_i32 = arith.constant 0 : i32
    %c0_i32_0 = arith.constant 0 : i32
    %c0_i32_1 = arith.constant 0 : i32
    return %arg0, %c0_i32, %c0_i32_0 : i32, i32, i32
  }
  func.func @transform_1(%arg0: i32) -> (i32, i32) {
    %c0_i32 = arith.constant 0 : i32
    %c0_i32_0 = arith.constant 0 : i32
    %c0_i32_1 = arith.constant 0 : i32
    return %c0_i32, %c0_i32_0 : i32, i32
  }
  func.func @transform_2(%arg0: i32) -> (i32, i32) {
    %c0_i32 = arith.constant 0 : i32
    %c0_i32_0 = arith.constant 0 : i32
    %c0_i32_1 = arith.constant 0 : i32
    return %c0_i32, %c0_i32_0 : i32, i32
  }
  func.func @transform_3(%arg0: i32) -> (i32, i32) {
    %c0_i32 = arith.constant 0 : i32
    %c0_i32_0 = arith.constant 0 : i32
    %c0_i32_1 = arith.constant 0 : i32
    return %c0_i32, %c0_i32_0 : i32, i32
  }
  func.func @transform_4(%arg0: i32) -> (i32, i32) {
    %c0_i32 = arith.constant 0 : i32
    %c0_i32_0 = arith.constant 0 : i32
    %c0_i32_1 = arith.constant 0 : i32
    return %c0_i32, %c0_i32_0 : i32, i32
  }
  func.func @transform_5(%arg0: i32) -> (i32, i32) {
    %c0_i32 = arith.constant 0 : i32
    %c0_i32_0 = arith.constant 0 : i32
    %c0_i32_1 = arith.constant 0 : i32
    return %c0_i32, %c0_i32_0 : i32, i32
  }
  func.func @transform_6(%arg0: i32) -> (i32, i32) {
    %c0_i32 = arith.constant 0 : i32
    %c0_i32_0 = arith.constant 0 : i32
    %c0_i32_1 = arith.constant 0 : i32
    return %c0_i32, %c0_i32_0 : i32, i32
  }
  func.func @transform_7(%arg0: i32) -> (i32, i32) {
    %c0_i32 = arith.constant 0 : i32
    %c0_i32_0 = arith.constant 0 : i32
    %c0_i32_1 = arith.constant 0 : i32
    return %c0_i32, %c0_i32_0 : i32, i32
  }
  func.func @transform_8(%arg0: i32) -> (i32, i32) {
    %c0_i32 = arith.constant 0 : i32
    %c0_i32_0 = arith.constant 0 : i32
    %c0_i32_1 = arith.constant 0 : i32
    return %c0_i32, %c0_i32_0 : i32, i32
  }
  func.func @transform_9(%arg0: i32) -> (i32, i32) {
    %c0_i32 = arith.constant 0 : i32
    %c0_i32_0 = arith.constant 0 : i32
    %c0_i32_1 = arith.constant 0 : i32
    return %c0_i32, %c0_i32_0 : i32, i32
  }
  func.func @transform_10(%arg0: i32) -> (i32, i32) {
    %c0_i32 = arith.constant 0 : i32
    %c0_i32_0 = arith.constant 0 : i32
    %c0_i32_1 = arith.constant 0 : i32
    return %c0_i32, %c0_i32_0 : i32, i32
  }
  func.func @transform_11(%arg0: i32) -> (i32, i32, i32) {
    %c0_i32 = arith.constant 0 : i32
    %c0_i32_0 = arith.constant 0 : i32
    %c0_i32_1 = arith.constant 0 : i32
    return %arg0, %c0_i32, %c0_i32_0 : i32, i32, i32
  }
}

</mosaic_0001>

<bundles_post_ra>
// kernel: tpu_custom_call.1
= control target key start
LH: loop header
LB: loop body
LE: loop exit
PB: predicated region body
PF: predicated region fallthrough
CT: control target
= control target key end

     0   :  { %s3167_s0 = inlined_call_operand.hbm [shape: f32[2,8,128], index: 0, kind: input, shape index: {}]   ;;  %s3168_s1 = inlined_call_operand.hbm [shape: f32[1,128], index: 1, kind: input, shape index: {}]   ;;  %s3169_s2 = inlined_call_operand.hbm [shape: bf16[128,384], index: 2, kind: input, shape index: {}]   ;;  %s3170_s3 = inlined_call_operand.hbm [shape: bf16[128,128], index: 3, kind: input, shape index: {}]   ;;  %s3171_s4 = inlined_call_operand.vmem [shape: f32[8,32], index: 4, kind: input, shape index: {}]   ;;  %s3172_s5 = inlined_call_operand.vmem [shape: f32[8,32], index: 5, kind: input, shape index: {}]   ;;  %s3173_s6 = inlined_call_operand.vmem [shape: f32[1,128], index: 6, kind: input, shape index: {}]   ;;  %s3174_s7 = inlined_call_operand.hbm [shape: bf16[128,256], index: 7, kind: input, shape index: {}]   ;;  %s3175_s8 = inlined_call_operand.vmem [shape: f32[1,256], index: 8, kind: input, shape index: {}]   ;;  %s3176_s9 = inlined_call_operand.hbm [shape: bf16[128,128], index: 9, kind: input, shape index: {}]   ;;  %s3177_s10 = inlined_call_operand.vmem [shape: f32[1,128], index: 10, kind: input, shape index: {}]   ;;  %s3178_s11 = inlined_call_operand.hbm [shape: f32[2,8,128], index: 11, kind: output, shape index: {}]  }
   0x1   :  { %3185 = sst [smem:[#allocation19_spill]] %s3168_s1 }
   0x2   :  { %3186 = sst [smem:[#allocation20_spill]] %s3170_s3 }
   0x3   :  { %3187 = sst [smem:[#allocation21_spill]] %s3178_s11 }
   0x4   :  { %16 = vsyncpa [#allocation3], 0 }
   0x5   :  { %18 = vsyncpa [#allocation3 + $0x1], 0 }
   0x6   :  { %19 = vsyncpa [#allocation6], 0 }
   0x7   :  { %20 = vsyncpa [#allocation9], 0 }
   0x8   :  { %21 = vsyncpa [#allocation12], 0 }
   0x9   :  { %22 = vsyncpa [#allocation4], 0 }
   0xa   :  { %24 = vsyncpa [#allocation4 + $0x1], 0  ;;  %s2645_s17 = smov 0   ;;  %s2647_s18 = smov 0  }
   0xb   :  { %s2649_s19 = smov 0   ;;  %s2651_s20 = smov 0  }
   0xc LB: > { %s2562_s21 = smov [#allocation5]   ;;  %s2666_s23 = sadd.s32 4294967295, %s2560_s20   ;;  %s2560_s20 = sphi %s2651_s20, %s3214_s20   ;;  %s2556_s19 = sphi %s2649_s19, %s3213_s19   ;;  %s2552_s18 = sphi %s2647_s18, %s3212_s18   ;;  %s2548_s17 = sphi %s2645_s17, %s3211_s17  }
   0xd   : > { %s310_s22 = sshll.u32 %s2562_s21, 4  ;;  %p1864_p0 = scmp.ge.s32.totalorder %s2560_s20, 1  ;;  %s2671_s22 = int_to_ptr.vmem [resolvable:$true] %s310_s22 }
   0xe   : > { %p3182_p1 = scmp.eq.s32.totalorder %s2666_s23, 0  ;;  %p297_p2 = scmp.lt.s32.totalorder %s2560_s20, 3 }
   0xf   : > { %s2563_s25 = smov [#allocation8]   ;;  %s2564_s28 = smov [#allocation7]  }
  0x10   : > { %p2673_p3 = pnand %p1864_p0, %p297_p2  ;;  %s333_s26 = sshll.u32 %s2563_s25, 4  ;;  %s2680_s26 = int_to_ptr.vmem [resolvable:$true] %s333_s26 }
  0x11   : > { %s320_s29 = sshll.u32 %s2564_s28, 4  ;;  %s3190_s1 = sld [smem:[#allocation19_spill]]  ;;  %s2688_s29 = int_to_ptr.vmem [resolvable:$true] %s320_s29 }
  0x12   : > { %s3188_s24 = scalar_select %p2673_p3, 1, 0 }
  0x13   : > { %p2127_p5 = pneg %p2673_p3 }
  0x15   : > { %p2684_p6 = pnand %p2127_p5, %p3182_p1 }
  0x17   : > { %s2312_s13 = scalar_lea.hbm %s3190_s1, 16  ;;  %p2698_p8 = pneg %p2684_p6 }
  0x18   : > { %p2313_p7 = scmp.ne.s32.totalorder %s3190_s1, %s2312_s13  ;;  %p2319_p11 = scmp.lt.u32.totalorder %s2312_s13, %s3190_s1 }
  0x1a   : > { %p2315_p9 = pnand %p2698_p8, %p2313_p7 }
  0x1c   : > { %p2316_p10 = pneg %p2315_p9 }
  0x1e   : > { %p2321_p12 = pnand %p2319_p11, %p2316_p10 }
  0x20   : > { %2324 = shalt.err (!%p2321_p12)
}
  0x21   : > { %s2325_s28 = scalar_lea.vmem %s2671_s22, 16  ;;  %s2332_s30 = scalar_lea.vmem %s2671_s22, 32 }
  0x22   : > { %p2326_p13 = scmp.ne.s32.totalorder %s2671_s22, %s2325_s28  ;;  %p2333_p5 = scmp.lt.s32.totalorder %s2671_s22, %s2671_s22 }
  0x23   : > { %p2334_p7 = scmp.lt.s32.totalorder %s2332_s30, %s2325_s28 }
  0x24   : > { %p2328_p0 = pnand %p2326_p13, %p2698_p8 }
  0x25   : > { %p2335_p9 = por %p2334_p7, %p2333_p5 }
  0x26   : > { %p2329_p2 = pneg %p2328_p0 }
  0x28   : > { %p2336_p4 = pnand %p2335_p9, %p2329_p2 }
  0x2a   : > { %2339 = shalt.err (!%p2336_p4)
}
  0x2b   : > { %2130 = dma.hbm_to_vmem [thread:$0]  (!%p2684_p6), %s3190_s1, 16, %s2671_s22, [#allocation6]  }
  0x2c   : > { %s3192_s3 = sld [smem:[#allocation20_spill]] }
  0x32   : > { %s2340_s21 = scalar_lea.hbm %s3192_s3, 1024 }
  0x33   : > { %p2341_p10 = scmp.ne.s32.totalorder %s3192_s3, %s2340_s21  ;;  %p2347_p4 = scmp.lt.u32.totalorder %s2340_s21, %s3192_s3 }
  0x35   : > { %p2343_p11 = pnand %p2341_p10, %p2698_p8 }
  0x37   : > { %p2344_p12 = pneg %p2343_p11 }
  0x39   : > { %p2349_p13 = pnand %p2347_p4, %p2344_p12 }
  0x3b   : > { %2352 = shalt.err (!%p2349_p13)
}
  0x3c   : > { %s2353_s22 = scalar_lea.vmem %s2680_s26, 1024  ;;  %p2361_p7 = scmp.lt.s32.totalorder %s2680_s26, %s2680_s26 }
  0x3d   : > { %p2354_p0 = scmp.ne.s32.totalorder %s2680_s26, %s2353_s22  ;;  %p2362_p9 = scmp.lt.s32.totalorder %s2353_s22, %s2353_s22 }
  0x3f   : > { %p2356_p2 = pnand %p2354_p0, %p2698_p8  ;;  %p2363_p10 = por %p2362_p9, %p2361_p7 }
  0x41   : > { %p2357_p5 = pneg %p2356_p2 }
  0x43   : > { %p2364_p11 = pnand %p2363_p10, %p2357_p5 }
  0x45   : > { %2367 = shalt.err (!%p2364_p11)
}
  0x46   : > { %s3180_s11 = smov 64   ;;  %s3181_s12 = smov 4  }
  0x47   : > { %2136 = dma.hbm_to_vmem [thread:$0]  (!%p2684_p6), %s3192_s3, 1024, %s2680_s26, [#allocation9], %s3180_s11, %s3180_s11, %s3181_s12  }
  0x48   : > { %s2368_s25 = scalar_lea.hbm %s3169_s2, 3072 }
  0x49   : > { %p2369_p12 = scmp.ne.s32.totalorder %s3169_s2, %s2368_s25  ;;  %p2375_p0 = scmp.lt.u32.totalorder %s2368_s25, %s3169_s2 }
  0x4b   : > { %p2371_p4 = pnand %p2369_p12, %p2698_p8 }
  0x4d   : > { %p2372_p13 = pneg %p2371_p4 }
  0x4f   : > { %p2377_p2 = pnand %p2375_p0, %p2372_p13 }
  0x51   : > { %2380 = shalt.err (!%p2377_p2)
}
  0x52   : > { %s2381_s26 = scalar_lea.vmem %s2688_s29, 3072  ;;  %p2389_p10 = scmp.lt.s32.totalorder %s2688_s29, %s2688_s29 }
  0x53   : > { %p2382_p5 = scmp.ne.s32.totalorder %s2688_s29, %s2381_s26  ;;  %p2390_p11 = scmp.lt.s32.totalorder %s2381_s26, %s2381_s26 }
  0x55   : > { %p2384_p7 = pnand %p2382_p5, %p2698_p8  ;;  %p2391_p12 = por %p2390_p11, %p2389_p10 }
  0x57   : > { %p2385_p9 = pneg %p2384_p7 }
  0x59   : > { %p2392_p4 = pnand %p2391_p12, %p2385_p9 }
  0x5b   : > { %2395 = shalt.err (!%p2392_p4)
}
  0x5c   : > { %s2567_s13 = smov 192   ;;  %s2568_s1 = smov 12  }
  0x5d   : > { %2133 = dma.hbm_to_vmem [thread:$0]  (!%p2684_p6), %s3169_s2, 3072, %s2688_s29, [#allocation6], %s2567_s13, %s2567_s13, %s2568_s1  }
  0x5e   : > { %s2569_s21 = smov [#allocation10]   ;;  %s2396_s22 = scalar_lea.hbm %s3174_s7, 2048 }
  0x5f   : > { %s355_s25 = sshll.u32 %s2569_s21, 4  ;;  %p2397_p13 = scmp.ne.s32.totalorder %s3174_s7, %s2396_s22  ;;  %s356_s25 = int_to_ptr.vmem [resolvable:$true] %s355_s25 }
  0x60   : > { %p2403_p5 = scmp.lt.u32.totalorder %s2396_s22, %s3174_s7 }
  0x61   : > { %p2399_p0 = pnand %p2397_p13, %p2698_p8 }
  0x63   : > { %p2400_p2 = pneg %p2399_p0 }
  0x65   : > { %p2405_p7 = pnand %p2403_p5, %p2400_p2 }
  0x67   : > { %2408 = shalt.err (!%p2405_p7)
}
  0x68   : > { %s2409_s29 = scalar_lea.vmem %s356_s25, 2048  ;;  %p2417_p12 = scmp.lt.s32.totalorder %s356_s25, %s356_s25 }
  0x69   : > { %p2410_p9 = scmp.ne.s32.totalorder %s356_s25, %s2409_s29  ;;  %p2418_p4 = scmp.lt.s32.totalorder %s2409_s29, %s2409_s29 }
  0x6b   : > { %p2412_p10 = pnand %p2410_p9, %p2698_p8  ;;  %p2419_p1 = por %p2418_p4, %p2417_p12 }
  0x6d   : > { %p2413_p11 = pneg %p2412_p10 }
  0x6f   : > { %p2420_p3 = pnand %p2419_p1, %p2413_p11 }
  0x71   : > { %2423 = shalt.err (!%p2420_p3)
}
  0x72   : > { %s2570_s11 = smov 128   ;;  %s2571_s13 = smov 8  }
  0x73   : > { %2139 = dma.hbm_to_vmem [thread:$0]  (!%p2684_p6), %s3174_s7, 2048, %s356_s25, [#allocation9], %s2570_s11, %s2570_s11, %s2571_s13  }
  0x74   : > { %s2572_s1 = smov [#allocation11]   ;;  %s2424_s28 = scalar_lea.hbm %s3176_s9, 1024 }
  0x75   : > { %s371_s14 = sshll.u32 %s2572_s1, 4  ;;  %p2425_p1 = scmp.ne.s32.totalorder %s3176_s9, %s2424_s28  ;;  %s372_s14 = int_to_ptr.vmem [resolvable:$true] %s371_s14 }
  0x76   : > { %p2431_p0 = scmp.lt.u32.totalorder %s2424_s28, %s3176_s9 }
  0x77   : > { %p2427_p3 = pnand %p2425_p1, %p2698_p8 }
  0x79   : > { %p2428_p13 = pneg %p2427_p3 }
  0x7b   : > { %p2433_p2 = pnand %p2431_p0, %p2428_p13 }
  0x7d   : > { %2436 = shalt.err (!%p2433_p2)
}
  0x7e   : > { %s2437_s25 = scalar_lea.vmem %s372_s14, 1024  ;;  %p2445_p10 = scmp.lt.s32.totalorder %s372_s14, %s372_s14 }
  0x7f   : > { %p2438_p5 = scmp.ne.s32.totalorder %s372_s14, %s2437_s25  ;;  %p2446_p11 = scmp.lt.s32.totalorder %s2437_s25, %s2437_s25 }
  0x81   : > { %p2440_p7 = pnand %p2438_p5, %p2698_p8  ;;  %p2447_p12 = por %p2446_p11, %p2445_p10 }
  0x83   : > { %p2441_p9 = pneg %p2440_p7 }
  0x85   : > { %p2448_p4 = pnand %p2447_p12, %p2441_p9 }
  0x87   : > { %2451 = shalt.err (!%p2448_p4)
}
  0x88   : > { %s3193_s11 = smov 4   ;;  %s3194_s13 = smov 64  }
  0x89   : > { %2142 = dma.hbm_to_vmem [thread:$0]  (!%p2684_p6), %s3176_s9, 1024, %s372_s14, [#allocation12], %s3194_s13, %s3194_s13, %s3193_s11  }
  0x8a   : > { %s1863_s27 = sadd.s32 4294967294, %s2560_s20   ;;  %s2810_s16 = sadd.s32 1, %s2560_s20  }
  0x8b   : > { %s37_s1 = sadd.s32 1, %s2556_s19  ;;  %s34_s15 = ssub.s32 %s2560_s20, %s2810_s16 }
  0x8c   : > { %p44_p8 = scmp.ne.s32.totalorder %s2556_s19, %s2552_s18  ;;  %p35_p1 = scmp.eq.s32.totalorder %s34_s15, 0 }
  0x8d   : > { %p45_p3 = scmp.eq.s32.totalorder %s2560_s20, 0  ;;  %p50_p13 = scmp.ne.s32.totalorder %s2552_s18, %s2548_s17 }
  0x8e   : > { %p284_p0 = scmp.eq.s32.totalorder %s2666_s23, 1  ;;  %p3195_p5 = scmp.eq.s32.totalorder %s2666_s23, 0 }
  0x8f   : > { %s2822_s21 = scalar_select %p35_p1, %s2556_s19, %s37_s1  }
  0x90   : > { %p46_p2 = por %p45_p3, %p44_p8  ;;  %p2826_p7 = por %p3195_p5, %p50_p13 }
  0x91   : > { %p2830_p6 = por %p284_p0, %p44_p8  ;;  %p290_p9 = scmp.eq.s32.totalorder %s1863_s27, 1 }
  0x92   : > { %p2156_p10 = scmp.lt.s32.totalorder %s2560_s20, 2  ;;  %s388_s30 = sand.u32 1, %s2556_s19  }
  0x93   : > { %s3197_s14 = scalar_select %p2830_p6, 1, 0 }
  0x94   : > { %p2836_p11 = por %p290_p9, %p50_p13  ;;  %s1871_s26 = sshll.u32 %s388_s30, 3 }
  0x95   : > { %s1872_s29 = sshll.u32 %s2560_s20, 7  ;;  %s392_s3 = scalar_lea.vmem [#allocation2], %s1871_s26 }
  0x96   : > { %s3198_s22 = scalar_select %p2836_p11, 1, 0 }
  0x97   : > { %s2844_s13 = scalar_lea.hbm %s3167_s0, %s1872_s29  ;;  %s399_s12 = sshll.u32 %s392_s3, 4  ;;  %s2850_s12 = int_to_ptr.vmem [resolvable:$true] %s399_s12 }
  0x98   : > { %p2846_p12 = pnand %p2156_p10, %p46_p2  ;;  %s389_s1 = scalar_lea.sflag [#allocation3], %s388_s30 }
  0x99   : > { %s2452_s15 = scalar_lea.hbm %s2844_s13, 128  ;;  %s2457_s25 = scalar_lea.hbm %s3167_s0, 256 }
  0x9a   : > { %p2453_p4 = scmp.ne.s32.totalorder %s2844_s13, %s2452_s15  ;;  %p2454_p8 = pneg %p2846_p12 }
  0x9b   : > { %p2458_p13 = scmp.lt.u32.totalorder %s2844_s13, %s3167_s0  ;;  %p2459_p0 = scmp.lt.u32.totalorder %s2457_s25, %s2452_s15 }
  0x9c   : > { %p2455_p1 = pnand %p2454_p8, %p2453_p4  ;;  %p2461_p5 = scmp.lt.u32.totalorder %s2452_s15, %s2844_s13 }
  0x9d   : > { %p2460_p2 = por %p2459_p0, %p2458_p13 }
  0x9e   : > { %p2456_p3 = pneg %p2455_p1 }
  0x9f   : > { %p2462_p9 = por %p2461_p5, %p2460_p2 }
  0xa1   : > { %p2463_p10 = pnand %p2462_p9, %p2456_p3 }
  0xa3   : > { %2466 = shalt.err (!%p2463_p10)
}
  0xa4   : > { %s2467_s30 = scalar_lea.vmem %s2850_s12, 128  ;;  %s2573_s29 = smov [#allocation2]  }
  0xa5   : > { %p2468_p4 = scmp.ne.s32.totalorder %s2850_s12, %s2467_s30  ;;  %s2472_s26 = sshll.u32 %s2573_s29, 4  ;;  %s2473_s26 = int_to_ptr.vmem [resolvable:$false] %s2472_s26 }
  0xa6   : > { %s2474_s11 = scalar_lea.vmem %s2473_s26, 256  ;;  %p2475_p6 = scmp.lt.s32.totalorder %s2850_s12, %s2473_s26 }
  0xa7   : > { %p2470_p1 = pnand %p2468_p4, %p2454_p8  ;;  %p2476_p13 = scmp.lt.s32.totalorder %s2474_s11, %s2467_s30 }
  0xa9   : > { %p2471_p11 = pneg %p2470_p1  ;;  %p2477_p0 = por %p2476_p13, %p2475_p6 }
  0xab   : > { %p2478_p2 = pnand %p2477_p0, %p2471_p11 }
  0xad   : > { %2481 = shalt.err (!%p2478_p2)
}
  0xae   : > { %2146 = dma.hbm_to_vmem [thread:$0]  (!%p2846_p12), %s2844_s13, 128, %s2850_s12, %s389_s1  }
  0xaf   : > { %p3200_p3 = scmp.ne.s32.totalorder %s3188_s24, 0 }
  0xb0   : > { %s2880_s15 = sand.u32 (!%p3200_p3), 1, %s2552_s18  }
  0xb1   : > { %408 = sbr.rel (%p3200_p3) target bundleno = 3042 (0xbe2), region = 64  ;;  %s1874_s25 = sshll.u32 (!%p3200_p3), %s2880_s15, 3 }
  0xb2   : > { %s411_s3 = scalar_lea.sflag (!%p3200_p3), [#allocation3], %s2880_s15  ;;  %s414_s30 = scalar_lea.vmem (!%p3200_p3), [#allocation2], %s1874_s25 }
  0xb8   : > { %2527 = dma.done.wait (%p2826_p7), %s411_s3, 128  }
  0xb9   : > { %2529 = vsyncadd (%p2826_p7), %s411_s3, 4294967168  ;;  %p3201_p6 = scmp.eq.s32.totalorder %s2666_s23, 0 }
  0xbb   : > { %2531 = dma.done.wait (%p3201_p6), [#allocation6], 3088   ;;  %p3202_p11 = pmov %p3201_p6 }
  0xbc   : > { %p3203_p12 = pmov %p3201_p6 }
  0xbd   : > { %2533 = vsyncadd (%p3202_p11), [#allocation6], 4294964208 }
  0xbe   : > { %2535 = dma.done.wait (%p3203_p12), [#allocation9], 3072   ;;  %p3204_p8 = pmov %p3201_p6 }
  0xbf   : > { %p3205_p5 = pmov %p3201_p6 }
  0xc0   : > { %2537 = vsyncadd (%p3204_p8), [#allocation9], 4294964224 }
  0xc1   : > { %2539 = dma.done.wait (%p3205_p5), [#allocation12], 1024   ;;  %p3206_p9 = pmov %p3205_p5 }
  0xc2   : > { %v2574_v0 = vmov 0.0   ;;  %v2903_v1 = vld [vmem:[%s414_s30] sm:$0xff]  ;;  %v2575_v24 = vmov 0   ;;  %vm2576_vm0 = vmmov 0   ;;  %v1881_v31 = vld [vmem:[#allocation5] ss:$0 sm:$0xff] }
  0xc3   : > { %2541 = vsyncadd (%p3206_p9), [#allocation12], 4294966272  ;;  %1995 = vmatprep.subr.bf16.mxu1 %v2574_v0  ;;  %v475_v2 = vmul.f32 %v2903_v1, %v2903_v1  ;;  %v2216_v3 = vld [vmem:[#allocation7 + $0x4] ss:$12 sps:$4 sm:$0xff]   ;;  %v2218_v4 = vld [vmem:[#allocation7] ss:$12 sps:$4 sm:$0xff]   ;;  %684 = vmatprep.mubr.bf16.mxu0 %v2575_v24 }
  0xc4   : > { %v2219_v5 = vld [vmem:[#allocation7 + $0x8] ss:$12 sps:$4 sm:$0xff]   ;;  %652 = vmatprep.subr.bf16.mxu0 %v2216_v3  ;;  %v2222_v7 = vld [vmem:[#allocation7 + $0x18] ss:$12 sps:$4 sm:$0xff]   ;;  %v2223_v8 = vld [vmem:[#allocation7 + $0x20] ss:$12 sps:$4 sm:$0xff]   ;;  %2011 = vmatprep.mubr.msk.bf16.mxu1 %vm2576_vm0, %v2574_v0 }
  0xc5   : > { %476 = vadd.xlane.f32.xlu0 %v475_v2  ;;  %v2220_v6 = vld [vmem:[#allocation7 + $0x1c] ss:$12 sps:$4 sm:$0xff]   ;;  %653 = vmatpush1.bf16.msra.mxu0 %v2218_v4  ;;  %v2224_v9 = vld [vmem:[#allocation7 + $0x34] ss:$12 sps:$4 sm:$0xff]   ;;  %v2227_v11 = vld [vmem:[#allocation7 + $0x38] ss:$12 sps:$4 sm:$0xff]  }
  0xc6   : > { %1996 = vmatpush3.bf16.msra.mxu1 %v2219_v5  ;;  %654 = vmatprep.subr.bf16.mxu0 %v2220_v6  ;;  %v2226_v10 = vld [vmem:[#allocation7 + $0x30] ss:$12 sps:$4 sm:$0xff]   ;;  %v2228_v12 = vld [vmem:[#allocation7 + $0x4c] ss:$12 sps:$4 sm:$0xff]   ;;  %v2230_v13 = vld [vmem:[#allocation7 + $0x48] ss:$12 sps:$4 sm:$0xff]  }
  0xc7   : > { %1997 = vmatprep.subr.bf16.mxu1 %v2574_v0  ;;  %v2231_v14 = vld [vmem:[#allocation7 + $0x50] ss:$12 sps:$4 sm:$0xff]   ;;  %v2234_v16 = vld [vmem:[#allocation7 + $0x60] ss:$12 sps:$4 sm:$0xff]   ;;  %v2235_v17 = vld [vmem:[#allocation7 + $0x68] ss:$12 sps:$4 sm:$0xff]  }
  0xc8   : > { %v2232_v15 = vld [vmem:[#allocation7 + $0x64] ss:$12 sps:$4 sm:$0xff]   ;;  %v2236_v18 = vld [vmem:[#allocation7 + $0x7c] ss:$12 sps:$4 sm:$0xff]   ;;  %v2239_v20 = vld [vmem:[#allocation7 + $0x80] ss:$12 sps:$4 sm:$0xff]  }
  0xc9   : > { %655 = vmatpush1.bf16.msra.mxu0 %v2222_v7  ;;  %v2238_v19 = vld [vmem:[#allocation7 + $0x78] ss:$12 sps:$4 sm:$0xff]   ;;  %v2240_v21 = vld [vmem:[#allocation7 + $0x94] ss:$12 sps:$4 sm:$0xff]   ;;  %v2242_v22 = vld [vmem:[#allocation7 + $0x90] ss:$12 sps:$4 sm:$0xff]  }
  0xca   : > { %1998 = vmatpush3.bf16.msra.mxu1 %v2223_v8  ;;  %656 = vmatprep.subr.bf16.mxu0 %v2224_v9  ;;  %v2243_v23 = vld [vmem:[#allocation7 + $0x98] ss:$12 sps:$4 sm:$0xff]   ;;  %v2246_v26 = vld [vmem:[#allocation7 + $0xa8] ss:$12 sps:$4 sm:$0xff]   ;;  %v2247_v27 = vld [vmem:[#allocation7 + $0xb0] ss:$12 sps:$4 sm:$0xff]  }
  0xcb   : > { %1999 = vmatprep.subr.bf16.mxu1 %v2574_v0  ;;  %v2244_v25 = vld [vmem:[#allocation7 + $0xac] ss:$12 sps:$4 sm:$0xff]   ;;  %s2577_s24 = smov 16   ;;  %s2578_s28 = smov 112   ;;  %vm749_vm1 = vcmask 130048   ;;  %vm769_vm2 = vcmask 261120  }
  0xcc   : > { %s2579_s13 = smov 80   ;;  %s2580_s12 = smov 48   ;;  %v2949_v46 = vld [vmem:[%s3171_s4] sm:$0xff]  ;;  %vm835_vm3 = vcmask 1043456   ;;  %vm818_vm5 = vcmask 64512   ;;  %vm1335_vm6 = vcmask 523264  }
  0xcd   : > { %657 = vmatpush1.bf16.msra.mxu0 %v2226_v10  ;;  %s2581_s29 = smov 32   ;;  %v2956_v48 = vld [vmem:[%s3172_s5] sm:$0xff]  ;;  %s2582_s3 = smov 64   ;;  %vm1337_vm7 = vcmask 785408  }
  0xce   : > { %2000 = vmatpush3.bf16.msra.mxu1 %v2227_v11  ;;  %658 = vmatprep.subr.bf16.mxu0 %v2228_v12  ;;  %s2583_s30 = smov 96   ;;  %s472_s26 = scalar_lea.vmem [#allocation13], %s1874_s25 }
  0xcf   : > { %2001 = vmatprep.subr.bf16.mxu1 %v2574_v0  ;;  %s1745_s11 = sshll.u32 %s472_s26, 4  ;;  %p3208_p10 = scmp.ne.s32.totalorder %s3197_s14, 0  ;;  %s3125_s11 = int_to_ptr.vmem [resolvable:$true] %s1745_s11 }
  0xd0   : > { %s2482_s25 = scalar_lea.vmem %s3125_s11, 128 }
  0xd1   : > { %659 = vmatpush1.bf16.msra.mxu0 %v2230_v13  ;;  %p2483_p7 = scmp.ne.s32.totalorder %s3125_s11, %s2482_s25 }
  0xd2   : > { %2002 = vmatpush3.bf16.msra.mxu1 %v2231_v14  ;;  %660 = vmatprep.subr.bf16.mxu0 %v2232_v15 }
  0xd3   : > { %2003 = vmatprep.subr.bf16.mxu1 %v2574_v0  ;;  %p2484_p4 = pnand %p2483_p7, %p3208_p10 }
  0xd5   : > { %661 = vmatpush1.bf16.msra.mxu0 %v2234_v16  ;;  %p2485_p1 = pneg %p2484_p4 }
  0xd6   : > { %2004 = vmatpush3.bf16.msra.mxu1 %v2235_v17  ;;  %662 = vmatprep.subr.bf16.mxu0 %v2236_v18  ;;  %v735_v18 = vlaneseq }
  0xd7   : > { %2005 = vmatprep.subr.bf16.mxu1 %v2574_v0 }
  0xd9   : > { %663 = vmatpush1.bf16.msra.mxu0 %v2238_v19  ;;  %v2988_v19 = vshrl.u32 %v735_v18, 7 }
  0xda   : > { %2006 = vmatpush3.bf16.msra.mxu1 %v2239_v20  ;;  %664 = vmatprep.subr.bf16.mxu0 %v2240_v21  ;;  %v2990_v20 = vand.u32 127, %v735_v18 }
  0xdb   : > { %2007 = vmatprep.subr.bf16.mxu1 %v2574_v0 }
  0xdc   : > { %vm739_vm4 = vcmp.gt.s32.totalorder %v2990_v20, %v2988_v19 }
  0xdd   : > { %665 = vmatpush1.bf16.msra.mxu0 %v2242_v22 }
  0xde   : > { %2008 = vmatpush3.bf16.msra.mxu1 %v2243_v23  ;;  %666 = vmatprep.subr.bf16.mxu0 %v2244_v25 }
  0xdf   : > { %2009 = vmatprep.subr.bf16.mxu1 %v2574_v0 }
  0xe1   : > { %667 = vmatpush1.bf16.msra.mxu0 %v2246_v26 }
  0xe2   : > { %2010 = vmatpush3.bf16.msra.mxu1 %v2247_v27  ;;  %2039 = vmatprep.subr.bf16.mxu0 %v2574_v0 }
  0xe3   : > { %2015 = vmatprep.subr.bf16.mxu1 %v2574_v0 }
 0x152   : > { %v477_v28 = vpop.xlane.xlu0 %476 }
 0x153   : > { %v479_v29 = vmul.f32 0.0078125, %v477_v28 }
 0x155   : > { %v480_v30 = vadd.f32 0.0001, %v479_v29 }
 0x157   : > { %2288 = vrsqrt.f32 %v480_v30 }
 0x161   : > { %v2289_v32 = vpop.eup %2288 }
 0x162   : > { %v489_v33 = vmul.f32 %v2289_v32, %v1881_v31 }
 0x164   : > { %v490_v34 = vmul.f32 %v489_v33, %v2903_v1 }
 0x166   : > { %v491_v35 = vpack.c.bf16 %v490_v34, %v490_v34 }
 0x168   : > { %685 = vmatmul.mubr.bf16.vlgmr.msra.gmra.mrb[0].mxu0 %v491_v35  ;;  %2012 = vmatmul.mubr.bf16.vlgmr.msra.gmra.mrb[0].mxu1 %v491_v35 }
 0x169   : > { %2017 = vmatprep.mubr.msk.bf16.mxu1 %vm2576_vm0, %v2574_v0  ;;  %2041 = vmatprep.mubr.msk.bf16.mxu0 %vm2576_vm0, %v2574_v0 }
 0x23b   : > { %v2924_v36 = vpop.f32.mrb[0].mxu0  ;;  %v727_v37 = vpop.f32.mrb[0].mxu1 }
 0x23c   : > { %v2926_v38 = vpop.f32.mrb[1].mxu0  ;;  %v2013_v39 = vpop.f32.mrb[1].mxu1  ;;  %v2932_v45 = vsub.f32 0.0, %v2924_v36  ;;  %v751_v59 = vmul.f32 %v2949_v46, %v2924_v36  ;;  %v2969_v4 = vpack.c.bf16 %v727_v37, %v727_v37 }
 0x23d   : > { %v730_v40 = vpop.f32.mrb[2].mxu1  ;;  %761 = vrot.lane.b32.xlu1 %v2926_v38, %s2577_s24  ;;  %v690_v41 = vpop.f32.mrb[2].mxu0  ;;  %v755_v42 = vsub.f32 0.0, %v2926_v38  ;;  %v765_v51 = vmul.f32 %v2949_v46, %v2926_v38 }
 0x23e   : > { %v691_v43 = vpop.f32.mrb[3].mxu0  ;;  %v2014_v44 = vpop.f32.mrb[3].mxu1  ;;  %v837_v11 = vsel %vm835_vm3, %v2969_v4, 0 }
 0x23f   : > { %757 = vrot.lane.b32.xlu0 %v755_v42, %s2578_s28 }
 0x241   : > { %742 = vrot.lane.b32.xlu1 %v2932_v45, %s2578_s28 }
 0x243   : > { %879 = vrot.lane.b32.xlu0 %v2932_v45, %s2579_s13 }
 0x245   : > { %746 = vrot.lane.b32.xlu1 %v2924_v36, %s2577_s24 }
 0x247   : > { %882 = vrot.lane.b32.xlu0 %v2924_v36, %s2578_s28 }
 0x249   : > { %901 = vrot.lane.b32.xlu1 %v2926_v38, %s2578_s28 }
 0x24b   : > { %1049 = vrot.lane.b32.xlu0 %v2926_v38, %s2579_s13 }
 0x24d   : > { %898 = vrot.lane.b32.xlu1 %v755_v42, %s2579_s13 }
 0x24f   : > { %1028 = vrot.lane.b32.xlu0 %v2932_v45, %s2580_s12 }
 0x253   : > { %1031 = vrot.lane.b32.xlu0 %v2924_v36, %s2579_s13  ;;  %s2584_s13 = smov [#allocation13]  }
 0x257   : > { %1046 = vrot.lane.b32.xlu0 %v755_v42, %s2580_s12 }
 0x25b   : > { %1193 = vrot.lane.b32.xlu0 %v755_v42, %s2577_s24 }
 0x25f   : > { %1196 = vrot.lane.b32.xlu0 %v2926_v38, %s2580_s12 }
 0x263   : > { %1178 = vrot.lane.b32.xlu0 %v2924_v36, %s2580_s12  ;;  %s2486_s12 = sshll.u32 %s2584_s13, 4  ;;  %s2487_s12 = int_to_ptr.vmem [resolvable:$false] %s2486_s12 }
 0x264   : > { %s2488_s27 = scalar_lea.vmem %s2487_s12, 256  ;;  %p2489_p13 = scmp.lt.s32.totalorder %s3125_s11, %s2487_s12 }
 0x265   : > { %p2490_p0 = scmp.lt.s32.totalorder %s2488_s27, %s2482_s25 }
 0x267   : > { %887 = vrot.lane.b32.xlu0 %v2949_v46, %s2581_s29  ;;  %p2491_p2 = por %p2490_p0, %p2489_p13 }
 0x269   : > { %p2492_p3 = pnand %p2491_p2, %p2485_p1 }
 0x2af   : > { %v762_v47 = vpop.permute.xlu1 %761 }
 0x2b1   : > { %v758_v49 = vpop.permute.xlu0 %757 }
 0x2b2   : > { %v764_v50 = vsel %vm749_vm1, %v758_v49, %v762_v47 }
 0x2b3   : > { %v766_v52 = vmul.f32 %v764_v50, %v2956_v48  ;;  %v743_v53 = vpop.permute.xlu1 %742 }
 0x2b5   : > { %v767_v54 = vadd.f32 %v766_v52, %v765_v51  ;;  %v880_v55 = vpop.permute.xlu0 %879 }
 0x2b7   : > { %v768_v56 = vpack.c.bf16 %v767_v54, %v767_v54  ;;  %v747_v57 = vpop.permute.xlu1 %746 }
 0x2b8   : > { %v750_v58 = vsel %vm749_vm1, %v743_v53, %v747_v57 }
 0x2b9   : > { %v752_v60 = vmul.f32 %v750_v58, %v2956_v48  ;;  %v883_v61 = vpop.permute.xlu0 %882  ;;  %v774_v62 = vsel %vm769_vm2, %v768_v56, 0 }
 0x2ba   : > { %v885_v63 = vsel %vm749_vm1, %v880_v55, %v883_v61  ;;  %2016 = vmatpush3.bf16.xpose.msra.mxu1 %v774_v62 }
 0x2bb   : > { %v753_v2 = vadd.f32 %v752_v60, %v751_v59  ;;  %v902_v3 = vpop.permute.xlu1 %901  ;;  %2021 = vmatprep.subr.bf16.mxu1 %v2574_v0  ;;  %v891_v30 = vmul.f32 %v885_v63, %v2956_v48 }
 0x2bd   : > { %v1050_v5 = vpop.permute.xlu0 %1049  ;;  %v754_v6 = vpack.c.bf16 %v753_v2, %v753_v2 }
 0x2bf   : > { %v899_v7 = vpop.permute.xlu1 %898 }
 0x2c0   : > { %v904_v8 = vsel %vm749_vm1, %v899_v7, %v902_v3 }
 0x2c1   : > { %v906_v9 = vmul.f32 %v904_v8, %v2956_v48  ;;  %2018 = vmatmul.mubr.msk.bf16.vlgmr.msra.gmra.mrb[4].mxu1 %vm769_vm2, %v754_v6  ;;  %v1029_v10 = vpop.permute.xlu0 %1028 }
 0x2c2   : > { %2022 = vmatpush3.bf16.msra.mxu1 %v837_v11  ;;  %2023 = vmatprep.mubr.msk.bf16.mxu1 %vm2576_vm0, %v2574_v0 }
 0x2c3   : > { %908 = vrot.lane.b32.xlu0 %v906_v9, %s2581_s29  ;;  %2027 = vmatprep.subr.bf16.mxu1 %v2574_v0 }
 0x2c5   : > { %v1032_v12 = vpop.permute.xlu0 %1031 }
 0x2c6   : > { %v1034_v16 = vsel %vm749_vm1, %v1029_v10, %v1032_v12 }
 0x2c7   : > { %1035 = vrot.lane.b32.xlu0 %v2949_v46, %s2582_s3  ;;  %v1039_v17 = vmul.f32 %v1034_v16, %v2956_v48 }
 0x2c9   : > { %v1047_v13 = vpop.permute.xlu0 %1046 }
 0x2ca   : > { %v1052_v14 = vsel %vm749_vm1, %v1047_v13, %v1050_v5 }
 0x2cb   : > { %v1054_v15 = vmul.f32 %v1052_v14, %v2956_v48 }
 0x2cd   : > { %1056 = vrot.lane.b32.xlu0 %v1054_v15, %s2582_s3  ;;  %v1194_v29 = vpop.permute.xlu0 %1193 }
 0x2d1   : > { %1041 = vrot.lane.b32.xlu0 %v1039_v17, %s2582_s3  ;;  %v1197_v31 = vpop.permute.xlu0 %1196 }
 0x2d2   : > { %v1199_v32 = vsel %vm749_vm1, %v1194_v29, %v1197_v31 }
 0x2d3   : > { %v1201_v33 = vmul.f32 %v1199_v32, %v2956_v48 }
 0x2d5   : > { %v1179_v34 = vpop.permute.xlu0 %1178 }
 0x2d9   : > { %v888_v35 = vpop.permute.xlu0 %887 }
 0x2da   : > { %v905_v42 = vmul.f32 %v888_v35, %v2926_v38  ;;  %v890_v49 = vmul.f32 %v888_v35, %v2924_v36 }
 0x335   : > { %v909_v37 = vpop.permute.xlu0 %908 }
 0x336   : > { %v911_v47 = vadd.f32 %v909_v37, %v905_v42 }
 0x338   : > { %v912_v52 = vpack.c.bf16 %v911_v47, %v911_v47 }
 0x339   : > { %v1036_v44 = vpop.permute.xlu0 %1035 }
 0x33a   : > { %v1053_v54 = vmul.f32 %v1036_v44, %v2926_v38 }
 0x33f   : > { %v1057_v51 = vpop.permute.xlu0 %1056 }
 0x340   : > { %v1059_v57 = vadd.f32 %v1057_v51, %v1053_v54 }
 0x342   : > { %v1060_v62 = vpack.c.bf16 %v1059_v57, %v1059_v57 }
 0x343   : > { %v1042_v60 = vpop.permute.xlu0 %1041 }
 0x394   : > { %v810_v21 = vpop.f32.mrb[4].mxu1 }
 0x395   : > { %v816_v22 = vmul.f32 0.17677669, %v810_v21  ;;  %v2019_v23 = vpop.f32.mrb[5].mxu1 }
 0x396   : > { %v813_v25 = vpop.f32.mrb[6].mxu1 }
 0x397   : > { %v2020_v26 = vpop.f32.mrb[7].mxu1  ;;  %v817_v27 = vsel %vm739_vm4, %v816_v22, -inf }
 0x398   : > { %v819_v28 = vsel %vm818_vm5, %v817_v27, -inf }
 0x399   : > { %820 = vmax.xlane.f32.xlu1 %v819_v28 }
 0x3aa   : > { %1175 = vrot.lane.b32.xlu1 %v2932_v45, %s2577_s24  ;;  %s3207_s24 = sld [smem:[#allocation21_spill]] }
 0x3ae   : > { %893 = vrot.lane.b32.xlu1 %v891_v30, %s2581_s29 }
 0x3b2   : > { %1182 = vrot.lane.b32.xlu1 %v2949_v46, %s2583_s30 }
 0x3b6   : > { %1203 = vrot.lane.b32.xlu1 %v1201_v33, %s2583_s30 }
 0x426   : > { %v821_v39 = vpop.xlane.xlu1 %820 }
 0x427   : > { %v822_v40 = vsub.f32 %v817_v27, %v821_v39 }
 0x429   : > { %v823_v41 = vmul.f32 1.442695, %v822_v40 }
 0x42a   : > { %v1176_v43 = vpop.permute.xlu1 %1175 }
 0x42b   : > { %2290 = vpow2.f32 %v823_v41  ;;  %v1181_v45 = vsel %vm749_vm1, %v1176_v43, %v1179_v34 }
 0x42c   : > { %v1186_v46 = vmul.f32 %v1181_v45, %v2956_v48  ;;  %v1038_v48 = vmul.f32 %v1036_v44, %v2924_v36 }
 0x42e   : > { %v894_v50 = vpop.permute.xlu1 %893  ;;  %1188 = vrot.lane.b32.xlu0 %v1186_v46, %s2583_s30  ;;  %v1044_v63 = vadd.f32 %v1042_v60, %v1038_v48 }
 0x42f   : > { %v896_v53 = vadd.f32 %v894_v50, %v890_v49 }
 0x430   : > { %v1045_v5 = vpack.c.bf16 %v1044_v63, %v1044_v63 }
 0x431   : > { %v897_v58 = vpack.c.bf16 %v896_v53, %v896_v53 }
 0x432   : > { %v1183_v55 = vpop.permute.xlu1 %1182  ;;  %917 = vrot.lane.b32.xlu0 %v912_v52, %s2583_s30 }
 0x433   : > { %v1185_v56 = vmul.f32 %v1183_v55, %v2924_v36  ;;  %v1200_v3 = vmul.f32 %v1183_v55, %v2926_v38 }
 0x435   : > { %v2291_v59 = vpop.eup %2290 }
 0x436   : > { %914 = vrot.lane.b32.xlu0 %v897_v58, %s2583_s30  ;;  %v825_v61 = vsel %vm818_vm5, %v2291_v59, 0.0  ;;  %v1204_v2 = vpop.permute.xlu1 %1203 }
 0x437   : > { %826 = vadd.xlane.f32.xlu1 %v825_v61  ;;  %v1206_v6 = vadd.f32 %v1204_v2, %v1200_v3 }
 0x439   : > { %v1207_v7 = vpack.c.bf16 %v1206_v6, %v1206_v6 }
 0x43a   : > { %1065 = vrot.lane.b32.xlu0 %v1060_v62, %s2582_s3 }
 0x43e   : > { %1062 = vrot.lane.b32.xlu0 %v1045_v5, %s2582_s3 }
 0x442   : > { %1212 = vrot.lane.b32.xlu0 %v1207_v7, %s2581_s29 }
 0x4a0   : > { %v1189_v36 = vpop.permute.xlu0 %1188 }
 0x4a1   : > { %v1191_v8 = vadd.f32 %v1189_v36, %v1185_v56 }
 0x4a3   : > { %v1192_v9 = vpack.c.bf16 %v1191_v8, %v1191_v8 }
 0x4a4   : > { %v918_v10 = vpop.permute.xlu0 %917 }
 0x4a5   : > { %1209 = vrot.lane.b32.xlu0 %v1192_v9, %s2581_s29  ;;  %v923_v22 = vsel %vm769_vm2, %v918_v10, 0 }
 0x4a8   : > { %v915_v11 = vpop.permute.xlu0 %914 }
 0x4ac   : > { %v1066_v12 = vpop.permute.xlu0 %1065 }
 0x4ad   : > { %v1071_v13 = vsel %vm769_vm2, %v1066_v12, 0 }
 0x4ae   : > { %2040 = vmatpush3.bf16.xpose.msra.mxu0 %v1071_v13 }
 0x4af   : > { %2051 = vmatprep.subr.bf16.mxu0 %v2574_v0 }
 0x4b0   : > { %v1063_v38 = vpop.permute.xlu0 %1062 }
 0x4b4   : > { %v1213_v14 = vpop.permute.xlu0 %1212 }
 0x4b5   : > { %v1218_v15 = vsel %vm769_vm2, %v1213_v14, 0  ;;  %2042 = vmatmul.mubr.msk.bf16.vlgmr.msra.gmra.mrb[4].mxu0 %vm769_vm2, %v1063_v38 }
 0x4b6   : > { %2052 = vmatpush3.bf16.xpose.msra.mxu0 %v1218_v15  ;;  %2053 = vmatprep.mubr.msk.bf16.mxu0 %vm2576_vm0, %v2574_v0 }
 0x4b7   : > { %2063 = vmatprep.subr.bf16.mxu0 %v2574_v0 }
 0x4c4   : > { %v827_v16 = vpop.xlane.xlu1 %826 }
 0x4c5   : > { %2292 = vrcp.f32 %v827_v16 }
 0x4cf   : > { %v2293_v17 = vpop.eup %2292 }
 0x4d0   : > { %v829_v18 = vmul.f32 %v2293_v17, %v2291_v59 }
 0x4d2   : > { %v830_v21 = vpack.c.bf16 %v829_v18, %v829_v18 }
 0x4d4   : > { %2024 = vmatmul.mubr.msk.bf16.vlgmr.msra.gmra.mrb[8].mxu1 %vm818_vm5, %v830_v21 }
 0x4d5   : > { %2028 = vmatpush3.bf16.xpose.msra.mxu1 %v923_v22  ;;  %2029 = vmatprep.mubr.msk.bf16.mxu1 %vm2576_vm0, %v2574_v0  ;;  %v2248_v22 = vld [vmem:[#allocation8] sm:$0xff]  }
 0x4d6   : > { %2033 = vmatprep.subr.bf16.mxu1 %v2574_v0 }
 0x4dc   : > { %2030 = vmatmul.mubr.msk.bf16.vlgmr.msra.gmra.mrb[12].mxu1 %vm769_vm2, %v915_v11 }
 0x4dd   : > { %2035 = vmatprep.mubr.msk.bf16.mxu1 %vm2576_vm0, %v2574_v0 }
 0x517   : > { %v1210_v23 = vpop.permute.xlu0 %1209 }
 0x518   : > { %2054 = vmatmul.mubr.msk.bf16.vlgmr.msra.gmra.mrb[8].mxu0 %vm769_vm2, %v1210_v23  ;;  %v2249_v23 = vld [vmem:[#allocation8 + $0x8] sm:$0xff]  }
 0x519   : > { %2079 = vmatprep.mubr.msk.bf16.mxu0 %vm2576_vm0, %v2574_v0  ;;  %2064 = vmatpush3.bf16.msra.mxu0 %v2248_v22  ;;  %v2285_v22 = vld [vmem:[#allocation11 + $0x28] sm:$0xff]  }
 0x51a   : > { %2065 = vmatprep.subr.bf16.mxu0 %v2574_v0 }
 0x51d   : > { %2066 = vmatpush3.bf16.msra.mxu0 %v2249_v23  ;;  %v2286_v23 = vld [vmem:[#allocation11 + $0x30] sm:$0xff]  }
 0x51e   : > { %2067 = vmatprep.subr.bf16.mxu0 %v2574_v0 }
 0x588   : > { %v1107_v25 = vpop.f32.mrb[4].mxu0 }
 0x589   : > { %v1113_v26 = vmul.f32 0.17677669, %v1107_v25  ;;  %v2043_v27 = vpop.f32.mrb[5].mxu0  ;;  %v2250_v25 = vld [vmem:[#allocation8 + $0x10] sm:$0xff]  }
 0x58a   : > { %v1110_v28 = vpop.f32.mrb[6].mxu0  ;;  %2068 = vmatpush3.bf16.msra.mxu0 %v2250_v25  ;;  %v2252_v27 = vld [vmem:[#allocation8 + $0x20] sm:$0xff]   ;;  %v2287_v25 = vld [vmem:[#allocation11 + $0x38] sm:$0xff]  }
 0x58b   : > { %v2044_v29 = vpop.f32.mrb[7].mxu0  ;;  %v1114_v30 = vsel %vm739_vm4, %v1113_v26, -inf  ;;  %2069 = vmatprep.subr.bf16.mxu0 %v2574_v0  ;;  %v2251_v26 = vld [vmem:[#allocation8 + $0x18] sm:$0xff]   ;;  %v2254_v28 = vld [vmem:[#allocation8 + $0x30] sm:$0xff]  }
 0x58c   : > { %v1115_v31 = vsel %vm818_vm5, %v1114_v30, -inf }
 0x58d   : > { %1116 = vmax.xlane.f32.xlu1 %v1115_v31 }
 0x58e   : > { %2070 = vmatpush3.bf16.msra.mxu0 %v2251_v26  ;;  %v1481_v26 = vsub.s32 0, %v2988_v19 }
 0x58f   : > { %2071 = vmatprep.subr.bf16.mxu0 %v2574_v0 }
 0x592   : > { %2072 = vmatpush3.bf16.msra.mxu0 %v2252_v27  ;;  %v1477_v27 = vld [vmem:[%s3175_s8] sm:$0x3] }
 0x593   : > { %2073 = vmatprep.subr.bf16.mxu0 %v2574_v0 }
 0x5a7   : > { %v3045_v32 = vpop.f32.mrb[8].mxu1 }
 0x5a8   : > { %v2025_v33 = vpop.f32.mrb[9].mxu1 }
 0x5a9   : > { %v876_v34 = vpop.f32.mrb[10].mxu1 }
 0x5aa   : > { %v2026_v35 = vpop.f32.mrb[11].mxu1  ;;  %v2255_v34 = vld [vmem:[#allocation8 + $0x38] sm:$0xff]  }
 0x5af   : > { %v959_v37 = vpop.f32.mrb[12].mxu1 }
 0x5b0   : > { %v965_v39 = vmul.f32 0.17677669, %v959_v37  ;;  %v2031_v40 = vpop.f32.mrb[13].mxu1 }
 0x5b1   : > { %v962_v41 = vpop.f32.mrb[14].mxu1 }
 0x5b2   : > { %v2032_v42 = vpop.f32.mrb[15].mxu1  ;;  %v966_v43 = vsel %vm739_vm4, %v965_v39, -inf }
 0x5b3   : > { %v967_v44 = vsel %vm818_vm5, %v966_v43, -inf }
 0x5b4   : > { %968 = vmax.xlane.f32.xlu0 %v967_v44 }
 0x5ca   : > { %980 = vrot.lane.b32.xlu0 %v2969_v4, %s2583_s30 }
 0x5eb   : > { %v1254_v45 = vpop.f32.mrb[8].mxu0 }
 0x5ec   : > { %v1260_v47 = vmul.f32 0.17677669, %v1254_v45  ;;  %v2055_v46 = vpop.f32.mrb[9].mxu0 }
 0x5ed   : > { %v1257_v49 = vpop.f32.mrb[10].mxu0 }
 0x5ee   : > { %v2056_v50 = vpop.f32.mrb[11].mxu0  ;;  %v1261_v51 = vsel %vm739_vm4, %v1260_v47, -inf }
 0x5ef   : > { %v1262_v52 = vsel %vm818_vm5, %v1261_v51, -inf }
 0x5f0   : > { %1263 = vmax.xlane.f32.xlu1 %v1262_v52 }
 0x61a   : > { %v1117_v53 = vpop.xlane.xlu1 %1116 }
 0x61b   : > { %v1118_v54 = vsub.f32 %v1114_v30, %v1117_v53  ;;  %v2256_v53 = vld [vmem:[#allocation10] ss:$8 sps:$4 sm:$0xff]  }
 0x61d   : > { %v1119_v55 = vmul.f32 1.442695, %v1118_v54  ;;  %v2258_v54 = vld [vmem:[#allocation10 + $0x4] ss:$8 sps:$4 sm:$0xff]  }
 0x61f   : > { %2294 = vpow2.f32 %v1119_v55  ;;  %v2261_v55 = vld [vmem:[#allocation10 + $0x14] ss:$8 sps:$4 sm:$0xff]  }
 0x629   : > { %v2295_v56 = vpop.eup %2294 }
 0x62a   : > { %v1121_v57 = vsel %vm818_vm5, %v2295_v56, 0.0 }
 0x62b   : > { %1122 = vadd.xlane.f32.xlu1 %v1121_v57  ;;  %v2264_v57 = vld [vmem:[#allocation10 + $0x24] ss:$8 sps:$4 sm:$0xff]  }
 0x641   : > { %v969_v58 = vpop.xlane.xlu0 %968 }
 0x642   : > { %v970_v20 = vsub.f32 %v966_v43, %v969_v58  ;;  %v2262_v58 = vld [vmem:[#allocation10 + $0x20] ss:$8 sps:$4 sm:$0xff]  }
 0x644   : > { %v971_v62 = vmul.f32 1.442695, %v970_v20 }
 0x645   : > { %v981_v59 = vpop.permute.xlu0 %980 }
 0x646   : > { %v986_v60 = vsel %vm835_vm3, %v981_v59, 0 }
 0x647   : > { %2034 = vmatpush3.bf16.msra.mxu1 %v986_v60 }
 0x648   : > { %2045 = vmatprep.subr.bf16.mxu1 %v2574_v0 }
 0x67d   : > { %v1264_v48 = vpop.xlane.xlu1 %1263 }
 0x67e   : > { %v1265_v61 = vsub.f32 %v1261_v51, %v1264_v48 }
 0x680   : > { %v1266_v63 = vmul.f32 1.442695, %v1265_v61 }
 0x682   : > { %2296 = vpow2.f32 %v1266_v63  ;;  %v2265_v63 = vld [vmem:[#allocation10 + $0x30] ss:$8 sps:$4 sm:$0xff]  }
 0x683   : > { %2298 = vpow2.f32 %v971_v62  ;;  %v2267_v62 = vld [vmem:[#allocation10 + $0x34] ss:$8 sps:$4 sm:$0xff]  }
 0x68c   : > { %v2297_v2 = vpop.eup %2296 }
 0x68d   : > { %v1268_v3 = vsel %vm818_vm5, %v2297_v2, 0.0  ;;  %v2299_v5 = vpop.eup %2298 }
 0x68e   : > { %1269 = vadd.xlane.f32.xlu1 %v1268_v3  ;;  %v973_v6 = vsel %vm818_vm5, %v2299_v5, 0.0  ;;  %v2270_v3 = vld [vmem:[#allocation10 + $0x44] ss:$8 sps:$4 sm:$0xff]  }
 0x692   : > { %974 = vadd.xlane.f32.xlu1 %v973_v6  ;;  %v2271_v6 = vld [vmem:[#allocation10 + $0x50] ss:$8 sps:$4 sm:$0xff]  }
 0x6a3   : > { %1127 = vrot.lane.b32.xlu1 %v2969_v4, %s2582_s3 }
 0x6a7   : > { %1274 = vrot.lane.b32.xlu1 %v2969_v4, %s2581_s29 }
 0x6b8   : > { %v1123_v7 = vpop.xlane.xlu1 %1122 }
 0x71b   : > { %v1270_v36 = vpop.xlane.xlu1 %1269 }
 0x71f   : > { %v975_v8 = vpop.xlane.xlu1 %974 }
 0x720   : > { %2300 = vrcp.f32 %v975_v8  ;;  %v2277_v8 = vld [vmem:[#allocation10 + $0x70] ss:$8 sps:$4 sm:$0xff]  }
 0x721   : > { %2302 = vrcp.f32 %v1123_v7  ;;  %v2274_v7 = vld [vmem:[#allocation10 + $0x60] ss:$8 sps:$4 sm:$0xff]  }
 0x722   : > { %2304 = vrcp.f32 %v1270_v36  ;;  %v2279_v36 = vld [vmem:[#allocation10 + $0x74] ss:$8 sps:$4 sm:$0xff]  }
 0x723   : > { %v1128_v11 = vpop.permute.xlu1 %1127 }
 0x724   : > { %v1133_v38 = vsel %vm835_vm3, %v1128_v11, 0 }
 0x727   : > { %v1275_v14 = vpop.permute.xlu1 %1274 }
 0x728   : > { %v1280_v17 = vsel %vm835_vm3, %v1275_v14, 0 }
 0x72a   : > { %v2301_v9 = vpop.eup %2300 }
 0x72b   : > { %v977_v10 = vmul.f32 %v2301_v9, %v2299_v5  ;;  %v2303_v13 = vpop.eup %2302  ;;  %v2273_v5 = vld [vmem:[#allocation10 + $0x54] ss:$8 sps:$4 sm:$0xff]  }
 0x72c   : > { %v1125_v4 = vmul.f32 %v2303_v13, %v2295_v56  ;;  %v2305_v16 = vpop.eup %2304  ;;  %v2259_v56 = vld [vmem:[#allocation10 + $0x10] ss:$8 sps:$4 sm:$0xff]  }
 0x72d   : > { %v978_v12 = vpack.c.bf16 %v977_v10, %v977_v10  ;;  %v1272_v18 = vmul.f32 %v2305_v16, %v2297_v2  ;;  %v2268_v2 = vld [vmem:[#allocation10 + $0x40] ss:$8 sps:$4 sm:$0xff]  }
 0x72e   : > { %v1126_v15 = vpack.c.bf16 %v1125_v4, %v1125_v4  ;;  %v2281_v16 = vld [vmem:[#allocation11 + $0x8] sm:$0xff]  }
 0x72f   : > { %2036 = vmatmul.mubr.msk.bf16.vlgmr.msra.gmra.mrb[16].mxu1 %vm818_vm5, %v978_v12  ;;  %v1273_v21 = vpack.c.bf16 %v1272_v18, %v1272_v18  ;;  %v1922_v12 = vld [vmem:[%s3173_s6] ss:$0 sm:$0xff]  ;;  %v2283_v18 = vld [vmem:[#allocation11 + $0x18] sm:$0xff]  }
 0x730   : > { %2046 = vmatpush3.bf16.msra.mxu1 %v1133_v38  ;;  %2047 = vmatprep.mubr.msk.bf16.mxu1 %vm2576_vm0, %v2574_v0 }
 0x731   : > { %2057 = vmatprep.subr.bf16.mxu1 %v2574_v0 }
 0x737   : > { %2048 = vmatmul.mubr.msk.bf16.vlgmr.msra.gmra.mrb[20].mxu1 %vm818_vm5, %v1126_v15  ;;  %v2280_v15 = vld [vmem:[#allocation11] sm:$0xff]  }
 0x738   : > { %2058 = vmatpush3.bf16.msra.mxu1 %v1280_v17  ;;  %2059 = vmatprep.mubr.msk.bf16.mxu1 %vm2576_vm0, %v2574_v0  ;;  %v2282_v17 = vld [vmem:[#allocation11 + $0x10] sm:$0xff]  }
 0x739   : > { %1569 = vmatprep.subr.bf16.mxu1 %v2258_v54 }
 0x73f   : > { %2060 = vmatmul.mubr.msk.bf16.vlgmr.msra.gmra.mrb[24].mxu1 %vm818_vm5, %v1273_v21  ;;  %v2284_v21 = vld [vmem:[#allocation11 + $0x20] sm:$0xff]  }
 0x740   : > { %1601 = vmatprep.mubr.bf16.mxu1 %v2575_v24  ;;  %v2253_v24 = vld [vmem:[#allocation8 + $0x28] sm:$0xff]   ;;  %1570 = vmatpush1.bf16.msra.mxu1 %v2256_v53 }
 0x741   : > { %2074 = vmatpush3.bf16.msra.mxu0 %v2253_v24  ;;  %1571 = vmatprep.subr.bf16.mxu1 %v2261_v55  ;;  %v1482_v24 = vrot.slane %v1477_v27, %v1481_v26 }
 0x742   : > { %2075 = vmatprep.subr.bf16.mxu0 %v2574_v0 }
 0x744   : > { %1572 = vmatpush1.bf16.msra.mxu1 %v2259_v56 }
 0x745   : > { %2076 = vmatpush3.bf16.msra.mxu0 %v2254_v28  ;;  %1573 = vmatprep.subr.bf16.mxu1 %v2264_v57 }
 0x746   : > { %2077 = vmatprep.subr.bf16.mxu0 %v2574_v0 }
 0x748   : > { %1574 = vmatpush1.bf16.msra.mxu1 %v2262_v58 }
 0x749   : > { %2078 = vmatpush3.bf16.msra.mxu0 %v2255_v34  ;;  %1575 = vmatprep.subr.bf16.mxu1 %v2267_v62 }
 0x74a   : > { %2083 = vmatprep.subr.bf16.mxu0 %v2574_v0 }
 0x74c   : > { %1576 = vmatpush1.bf16.msra.mxu1 %v2265_v63 }
 0x74d   : > { %1577 = vmatprep.subr.bf16.mxu1 %v2270_v3 }
 0x750   : > { %1578 = vmatpush1.bf16.msra.mxu1 %v2268_v2 }
 0x751   : > { %1579 = vmatprep.subr.bf16.mxu1 %v2273_v5 }
 0x754   : > { %1580 = vmatpush1.bf16.msra.mxu1 %v2271_v6 }
 0x802   : > { %v1022_v29 = vpop.f32.mrb[16].mxu1 }
 0x803   : > { %1323 = vrot.lane.b32.xlu1 %v1022_v29, %s2581_s29  ;;  %v2037_v30 = vpop.f32.mrb[17].mxu1  ;;  %s1949_s29 = sshll.u32 %s2666_s23, 7  ;;  %s1732_s23 = scalar_lea.sflag [#allocation4], %s2880_s15 }
 0x804   : > { %v1025_v31 = vpop.f32.mrb[18].mxu1  ;;  %s3123_s28 = scalar_lea.hbm %s3207_s24, %s1949_s29 }
 0x805   : > { %v2038_v33 = vpop.f32.mrb[19].mxu1 }
 0x80a   : > { %v1169_v35 = vpop.f32.mrb[20].mxu1 }
 0x80b   : > { %1327 = vrot.lane.b32.xlu0 %v1169_v35, %s2582_s3  ;;  %v2049_v37 = vpop.f32.mrb[21].mxu1 }
 0x80c   : > { %v1172_v39 = vpop.f32.mrb[22].mxu1 }
 0x80d   : > { %v2050_v40 = vpop.f32.mrb[23].mxu1  ;;  %v1485_v39 = vsub.s32 1, %v2988_v19 }
 0x80f   : > { %v1486_v40 = vrot.slane %v1477_v27, %v1485_v39 }
 0x812   : > { %v1316_v41 = vpop.f32.mrb[24].mxu1 }
 0x813   : > { %1331 = vrot.lane.b32.xlu1 %v1316_v41, %s2583_s30  ;;  %v2061_v42 = vpop.f32.mrb[25].mxu1 }
 0x814   : > { %v1319_v43 = vpop.f32.mrb[26].mxu1 }
 0x815   : > { %v2062_v44 = vpop.f32.mrb[27].mxu1 }
 0x875   : > { %v1324_v45 = vpop.permute.xlu1 %1323 }
 0x876   : > { %v1334_v46 = vsel %vm769_vm2, %v3045_v32, %v1324_v45 }
 0x87d   : > { %v1328_v47 = vpop.permute.xlu0 %1327 }
 0x87e   : > { %v1336_v49 = vsel %vm1335_vm6, %v1334_v46, %v1328_v47  ;;  %v1939_v47 = vld [vmem:[%s3177_s10] ss:$0 sm:$0xff] }
 0x885   : > { %v1332_v50 = vpop.permute.xlu1 %1331 }
 0x886   : > { %v1338_v51 = vsel %vm1337_vm7, %v1336_v49, %v1332_v50 }
 0x887   : > { %v1339_v52 = vpack.c.bf16 %v1338_v51, %v1338_v51 }
 0x889   : > { %2080 = vmatmul.mubr.bf16.vlgmr.msra.gmra.mrb[12].mxu0 %v1339_v52 }
 0x88a   : > { %2099 = vmatprep.mubr.msk.bf16.mxu0 %vm2576_vm0, %v2574_v0  ;;  %2084 = vmatpush3.bf16.msra.mxu0 %v2280_v15 }
 0x88b   : > { %2085 = vmatprep.subr.bf16.mxu0 %v2574_v0 }
 0x88e   : > { %2086 = vmatpush3.bf16.msra.mxu0 %v2281_v16 }
 0x88f   : > { %2087 = vmatprep.subr.bf16.mxu0 %v2574_v0 }
 0x892   : > { %2088 = vmatpush3.bf16.msra.mxu0 %v2282_v17 }
 0x893   : > { %2089 = vmatprep.subr.bf16.mxu0 %v2574_v0 }
 0x896   : > { %2090 = vmatpush3.bf16.msra.mxu0 %v2283_v18 }
 0x897   : > { %2091 = vmatprep.subr.bf16.mxu0 %v2574_v0 }
 0x89a   : > { %2092 = vmatpush3.bf16.msra.mxu0 %v2284_v21 }
 0x89b   : > { %2093 = vmatprep.subr.bf16.mxu0 %v2574_v0 }
 0x89e   : > { %2094 = vmatpush3.bf16.msra.mxu0 %v2285_v22 }
 0x89f   : > { %2095 = vmatprep.subr.bf16.mxu0 %v2574_v0 }
 0x8a2   : > { %2096 = vmatpush3.bf16.msra.mxu0 %v2286_v23 }
 0x8a3   : > { %2097 = vmatprep.subr.bf16.mxu0 %v2574_v0 }
 0x8a6   : > { %2098 = vmatpush3.bf16.msra.mxu0 %v2287_v25 }
 0x95c   : > { %v1438_v32 = vpop.f32.mrb[12].mxu0 }
 0x95d   : > { %v3093_v59 = vadd.f32 %v1438_v32, %v2903_v1  ;;  %v2081_v60 = vpop.f32.mrb[13].mxu0  ;;  %v2276_v1 = vld [vmem:[#allocation10 + $0x64] ss:$8 sps:$4 sm:$0xff]  }
 0x95e   : > { %v1441_v20 = vpop.f32.mrb[14].mxu0  ;;  %1581 = vmatprep.subr.bf16.mxu1 %v2276_v1 }
 0x95f   : > { %v2082_v48 = vpop.f32.mrb[15].mxu0  ;;  %v1445_v61 = vmul.f32 %v3093_v59, %v3093_v59  ;;  %1582 = vmatpush1.bf16.msra.mxu1 %v2274_v7 }
 0x960   : > { %1583 = vmatprep.subr.bf16.mxu1 %v2279_v36 }
 0x961   : > { %1446 = vadd.xlane.f32.xlu0 %v1445_v61 }
 0x963   : > { %1584 = vmatpush1.bf16.msra.mxu1 %v2277_v8 }
 0x9ee   : > { %v1447_v9 = vpop.xlane.xlu0 %1446 }
 0x9ef   : > { %v1448_v10 = vmul.f32 0.0078125, %v1447_v9 }
 0x9f1   : > { %v1449_v11 = vadd.f32 0.0001, %v1448_v10 }
 0x9f3   : > { %2306 = vrsqrt.f32 %v1449_v11 }
 0x9fd   : > { %v2307_v13 = vpop.eup %2306 }
 0x9fe   : > { %v1458_v38 = vmul.f32 %v2307_v13, %v1922_v12 }
 0xa00   : > { %v1459_v4 = vmul.f32 %v1458_v38, %v3093_v59 }
 0xa02   : > { %v1460_v14 = vpack.c.bf16 %v1459_v4, %v1459_v4 }
 0xa04   : > { %1602 = vmatmul.mubr.bf16.vlgmr.msra.gmra.mrb[28].mxu1 %v1460_v14 }
 0xad7   : > { %v1603_v28 = vpop.f32.mrb[28].mxu1 }
 0xad8   : > { %v1604_v29 = vadd.f32 %v1603_v28, %v1482_v24  ;;  %v1605_v30 = vpop.f32.mrb[29].mxu1 }
 0xad9   : > { %v1607_v31 = vpop.f32.mrb[30].mxu1  ;;  %v1606_v43 = vadd.f32 %v1605_v30, %v1486_v40 }
 0xada   : > { %v1610_v33 = vsub.f32 0.0, %v1604_v29  ;;  %v1608_v34 = vpop.f32.mrb[31].mxu1 }
 0xadc   : > { %v1611_v35 = vmul.f32 1.442695, %v1610_v33 }
 0xade   : > { %2308 = vpow2.f32 %v1611_v35 }
 0xae8   : > { %v2309_v0 = vpop.eup %2308 }
 0xae9   : > { %v1613_v37 = vadd.f32 1.0, %v2309_v0 }
 0xaeb   : > { %2310 = vrcp.f32 %v1613_v37 }
 0xaf5   : > { %v2311_v41 = vpop.eup %2310 }
 0xaf6   : > { %v1615_v42 = vmul.f32 %v2311_v41, %v1604_v29 }
 0xaf8   : > { %v1616_v44 = vmul.f32 %v1615_v42, %v1606_v43 }
 0xafa   : > { %v1617_v45 = vpack.c.bf16 %v1616_v44, %v1616_v44 }
 0xafc   : > { %2100 = vmatmul.mubr.bf16.vlgmr.msra.gmra.mrb[16].mxu0 %v1617_v45 }
 0xbcf   : > { %v1723_v46 = vpop.f32.mrb[16].mxu0 }
 0xbd0   : > { %v1724_v49 = vadd.f32 %v1939_v47, %v1723_v46  ;;  %v2101_v19 = vpop.f32.mrb[17].mxu0 }
 0xbd1   : > { %v1726_v50 = vpop.f32.mrb[18].mxu0 }
 0xbd2   : > { %v1729_v51 = vadd.f32 %v1724_v49, %v3093_v59  ;;  %v2102_v52 = vpop.f32.mrb[19].mxu0 }
 0xbd4   : > { %1730 = vst [vmem:[%s472_s26] sm:$0xff] %v1729_v51 }
 0xbd5   : > { %2495 = shalt.err (!%p2492_p3)
}
 0xbd6   : > { %s2496_s15 = scalar_lea.hbm %s3123_s28, 128  ;;  %s2500_s26 = scalar_lea.hbm %s3207_s24, 256 }
 0xbd7   : > { %p2497_p6 = scmp.ne.s32.totalorder %s3123_s28, %s2496_s15  ;;  %p2501_p8 = scmp.lt.u32.totalorder %s3123_s28, %s3207_s24 }
 0xbd8   : > { %p2502_p5 = scmp.lt.u32.totalorder %s2500_s26, %s2496_s15  ;;  %p2504_p7 = scmp.lt.u32.totalorder %s2496_s15, %s3123_s28 }
 0xbd9   : > { %p2498_p11 = pnand %p2497_p6, %p3208_p10 }
 0xbda   : > { %p2503_p9 = por %p2502_p5, %p2501_p8 }
 0xbdb   : > { %p2499_p12 = pneg %p2498_p11 }
 0xbdc   : > { %p2505_p4 = por %p2504_p7, %p2503_p9 }
 0xbde   : > { %p2506_p1 = pnand %p2505_p4, %p2499_p12 }
 0xbe0   : > { %2509 = shalt.err (!%p2506_p1)
}
 0xbe1   : > { %2125 = dma.vmem_to_hbm [thread:$0]  (%p3208_p10), %s3125_s11, 128, %s3123_s28, %s1732_s23  }
 0xbe2 PF: > { %s1757_s25 = sand.u32 1, %s2548_s17   ;;  %p3209_p13 = scmp.ne.s32.totalorder %s3198_s22, 0 }
 0xbe3   : > { %p3210_p0 = scmp.ge.s32.totalorder %s2560_s20, 2  ;;  %s1758_s13 = scalar_lea.sflag [#allocation4], %s1757_s25 }
 0xbe5   : > { %p2148_p2 = pnand %p3210_p0, %p3209_p13 }
 0xbe7   : > { %2543 = dma.done.wait (!%p2148_p2), %s1758_s13, 128  }
 0xbe8   : > { %2545 = vsyncadd (!%p2148_p2), %s1758_s13, 4294967168  ;;  %p27_p3 = scmp.ge.s32.totalorder %s2810_s16, 4   ;;  %s3211_s17 = smov %s2552_s18 }
 0xbe9   : > { %s3212_s18 = smov %s2556_s19  ;;  %s3213_s19 = smov %s2822_s21 }
 0xbea   : > { %s3214_s20 = smov %s2810_s16  ;;  %29 = sbr.rel (!%p27_p3) target bundleno = 12 (0xc), region = 129 }
 0xbf1   :  { %1763 = vsyncpa [#allocation3], 1 }
 0xbf2   :  { %1765 = vsyncpa [#allocation3 + $0x1], 1 }
 0xbf3   :  { %1766 = vsyncpa [#allocation6], 1 }
 0xbf4   :  { %1767 = vsyncpa [#allocation9], 1 }
 0xbf5   :  { %1768 = vsyncpa [#allocation12], 1 }
 0xbf6   :  { %1769 = vsyncpa [#allocation4], 1 }
 0xbf7   :  { %1771 = vsyncpa [#allocation4 + $0x1], 1 }

</bundles_post_ra>
